<compile_context>
chip_gen: v5e
topology: v5e:2x2
jax: 0.10.0
libtpu: 0.0.40
codegen_flags: <defaults>
</compile_context>

<pallas_src>
import numpy as np
import jax
import jax.numpy as jnp
from jax.experimental import pallas as pl
from jax.experimental.pallas import tpu as pltpu

# Problem sizes (consistent with the module's forward)
N, C, H, W = 2, 4, 16, 16      # batch, channels, height, width
F = 8                          # num_filters
NC = 10                        # num_classes
KH = KW = 3
HC, WC = H - 2, W - 2          # 14, 14  (valid conv)
HP, WP = HC // 2, WC // 2      # 7, 7    (maxpool 2x2, stride 2)
K = C * KH * KW                # 36      (im2col depth, ij-major)
POOL = HP * WP                 # 49
HW = H * W                     # 256     (flattened spatial lanes per image)
CP = 16                        # padded class lanes (10 real + 6 pad)
NEG = -1e30                    # bias of padded class lanes -> softmax prob 0


def cnn_kernel(x_ref, wc_ref, bc_ref, wfc_ref, bfc_ref, o_ref):
    # x_ref:   (N*C, H*W) = (8, 256)   row = n*C + c, col = h*W + w
    # wc_ref:  (F, K)     = (8, 36)    k = (i*KW + j)*C + c
    # bc_ref:  (F, 1)
    # wfc_ref: (F, H*W, CP)            row p = 2*h2*W + 2*w2 holds fc weight, else 0
    # bfc_ref: (1, CP)                 cols >= NC are -1e30
    # o_ref:   (N, CP)                 softmax probabilities; wrapper slices [:, :NC]
    x8 = x_ref[...]
    wc = wc_ref[...]
    bc = bc_ref[...]
    wfc = wfc_ref[...]

    def shifted(a, s):
        # b[:, q] = a[:, q + s]; wrapped lanes only land on invalid conv/pool
        # positions, and those rows of wfc are zero, so they never leak.
        if s == 0:
            return a
        return jnp.concatenate([a[:, s:], a[:, :s]], axis=1)

    logit_rows = []
    for n in range(N):
        xn = x8[n * C:(n + 1) * C, :]                                   # (C, HW)

        # In-kernel im2col: patch row k = (i*KW + j)*C + c (matches wc layout).
        patches = jnp.concatenate(
            [shifted(xn, i * W + j) for i in range(KH) for j in range(KW)],
            axis=0)                                                     # (K, HW)

        # Conv2d(3x3, valid): one MXU matmul over the whole feature map.
        conv = jnp.dot(wc, patches,
                       preferred_element_type=jnp.float32)              # (F, HW)

        # MaxPool2d(2,2): max of the 4 window offsets {0, 1, W, W+1}; result is
        # valid at lanes p = 2*h2*W + 2*w2.  Bias + ReLU applied ONCE after the
        # max (relu(x+b) is monotone in x, b constant across the window).
        m = jnp.maximum(jnp.maximum(conv, shifted(conv, 1)),
                        jnp.maximum(shifted(conv, W), shifted(conv, W + 1)))
        pooled = jnp.maximum(m + bc, 0.0)                               # (F, HW)

        # Fully-connected layer: contract (f, p) directly against the scattered
        # fc-weight table (zero rows absorb every invalid/garbage lane), no
        # materialized flatten / relayout.
        acc = jnp.zeros((1, CP), jnp.float32)
        for f in range(F):
            acc = acc + jnp.dot(pooled[f:f + 1, :], wfc[f],
                                preferred_element_type=jnp.float32)     # (1, CP)
        logit_rows.append(acc)

    logits = jnp.concatenate(logit_rows, axis=0) + bfc_ref[...]         # (N, CP)

    # Softmax over the (padded) class lanes; -1e30 bias -> padded prob exactly 0.
    mx = jnp.max(logits, axis=-1, keepdims=True)
    e = jnp.exp(logits - mx)
    o_ref[...] = e / jnp.sum(e, axis=-1, keepdims=True)


def prepare_params(conv_w, conv_b, fc_w, fc_b):
    """One-time weight preprocessing (pure function of the weights) - hoisted out
    of the per-forward path per review feedback."""
    conv_w = np.asarray(conv_w, np.float32)
    fc_w = np.asarray(fc_w, np.float32)
    # Conv weight as (F, K) with k = (i*KW + j)*C + c (ij-major, matches kernel).
    wc = np.transpose(conv_w, (0, 2, 3, 1)).reshape(F, K)
    bc = np.asarray(conv_b, np.float32).reshape(F, 1)
    # FC weight scattered onto full-resolution flat positions p = 2*h2*W + 2*w2
    # (PyTorch flatten order is idx = f*POOL + h2*WP + w2); all other rows stay 0.
    w4 = fc_w.reshape(NC, F, HP, WP)
    wfc = np.zeros((F, HW, CP), np.float32)
    for h2 in range(HP):
        for w2 in range(WP):
            p = (2 * h2) * W + (2 * w2)
            wfc[:, p, :NC] = w4[:, :, h2, w2].T                         # (F, NC)
    # Padded class columns get a huge negative bias -> softmax prob exactly 0.
    bfc = np.full((1, CP), NEG, np.float32)
    bfc[0, :NC] = np.asarray(fc_b, np.float32)
    return jnp.asarray(wc), jnp.asarray(bc), jnp.asarray(wfc), jnp.asarray(bfc)


@jax.jit
def cnn_forward(x, wc, bc, wfc, bfc):
    # Only per-forward wrapper work: a free (contiguous) reshape of x.
    x8 = x.reshape(N * C, HW).astype(jnp.float32)
    vmem = pl.BlockSpec(memory_space=pltpu.MemorySpace.VMEM)
    out = pl.pallas_call(
        cnn_kernel,
        out_shape=jax.ShapeDtypeStruct((N, CP), jnp.float32),
        in_specs=[vmem] * 5,
        out_specs=vmem,
    )(x8, wc, bc, wfc, bfc)
    return out[:, :NC]


def reference(x, conv_w, conv_b, fc_w, fc_b):
    # Pure-JAX reference mirroring the PyTorch forward.
    y = jax.lax.conv_general_dilated(
        x, conv_w, window_strides=(1, 1), padding="VALID",
        dimension_numbers=("NCHW", "OIHW", "NCHW"))
    y = jax.nn.relu(y + conv_b[None, :, None, None])
    y = jax.lax.reduce_window(y, -jnp.inf, jax.lax.max,
                              (1, 1, 2, 2), (1, 1, 2, 2), "VALID")
    flat = y.reshape(x.shape[0], -1)
    logits = flat @ fc_w.T + fc_b
    return jax.nn.softmax(logits, axis=1)


if __name__ == "__main__":
    key = jax.random.PRNGKey(0)
    kx, kcw, kcb, kfw, kfb = jax.random.split(key, 5)
    # Deterministic synthetic parameters (same shapes as the nn.Module's params).
    x = jax.random.normal(kx, (N, C, H, W), jnp.float32)
    conv_w = jax.random.normal(kcw, (F, C, KH, KW), jnp.float32) * 0.1
    conv_b = jax.random.normal(kcb, (F,), jnp.float32) * 0.1
    fc_w = jax.random.normal(kfw, (NC, F * POOL), jnp.float32) * 0.05
    fc_b = jax.random.normal(kfb, (NC,), jnp.float32) * 0.05

    params = prepare_params(conv_w, conv_b, fc_w, fc_b)   # hoisted, run once
    out = jax.block_until_ready(cnn_forward(x, *params))
    ref = reference(x, conv_w, conv_b, fc_w, fc_b)
    assert out.shape == (N, NC)
    assert jnp.allclose(out, ref, atol=1e-5, rtol=1e-5), (out, ref)
    print("KERNEL_OK")
</pallas_src>

<mosaic_0001>
module attributes {stable_mosaic.version = 11 : i64} {
  func.func @cnn_kernel(%arg0: memref<8x256xf32, #tpu.memory_space<vmem>>, %arg1: memref<8x36xf32, #tpu.memory_space<vmem>>, %arg2: memref<8x1xf32, #tpu.memory_space<vmem>>, %arg3: memref<8x256x16xf32, #tpu.memory_space<vmem>>, %arg4: memref<1x16xf32, #tpu.memory_space<vmem>>, %arg5: memref<2x16xf32, #tpu.memory_space<vmem>>) attributes {dimension_semantics = [], scalar_prefetch = 0 : i64, scratch_operands = 0 : i64, tpu.core_type = #tpu.core_type<tc>} {
    %c0 = arith.constant 0 : index
    %c0_0 = arith.constant 0 : index
    %0 = vector.load %arg0[%c0, %c0_0] : memref<8x256xf32, #tpu.memory_space<vmem>>, vector<8x256xf32>
    %c0_1 = arith.constant 0 : index
    %c0_2 = arith.constant 0 : index
    %1 = vector.load %arg1[%c0_1, %c0_2] : memref<8x36xf32, #tpu.memory_space<vmem>>, vector<8x36xf32>
    %c0_3 = arith.constant 0 : index
    %c0_4 = arith.constant 0 : index
    %2 = vector.load %arg2[%c0_3, %c0_4] : memref<8x1xf32, #tpu.memory_space<vmem>>, vector<8x1xf32>
    %c0_5 = arith.constant 0 : index
    %c0_6 = arith.constant 0 : index
    %c0_7 = arith.constant 0 : index
    %3 = vector.load %arg3[%c0_5, %c0_6, %c0_7] : memref<8x256x16xf32, #tpu.memory_space<vmem>>, vector<8x256x16xf32>
    %4 = vector.extract_strided_slice %0 {offsets = [0, 0], sizes = [4, 256], strides = [1, 1]} : vector<8x256xf32> to vector<4x256xf32>
    %5 = vector.extract_strided_slice %4 {offsets = [0, 1], sizes = [4, 255], strides = [1, 1]} : vector<4x256xf32> to vector<4x255xf32>
    %6 = vector.extract_strided_slice %4 {offsets = [0, 0], sizes = [4, 1], strides = [1, 1]} : vector<4x256xf32> to vector<4x1xf32>
    %7 = tpu.concatenate %5, %6 in 1 : vector<4x255xf32>, vector<4x1xf32> -> vector<4x256xf32>
    %8 = vector.extract_strided_slice %4 {offsets = [0, 2], sizes = [4, 254], strides = [1, 1]} : vector<4x256xf32> to vector<4x254xf32>
    %9 = vector.extract_strided_slice %4 {offsets = [0, 0], sizes = [4, 2], strides = [1, 1]} : vector<4x256xf32> to vector<4x2xf32>
    %10 = tpu.concatenate %8, %9 in 1 : vector<4x254xf32>, vector<4x2xf32> -> vector<4x256xf32>
    %11 = vector.extract_strided_slice %4 {offsets = [0, 16], sizes = [4, 240], strides = [1, 1]} : vector<4x256xf32> to vector<4x240xf32>
    %12 = vector.extract_strided_slice %4 {offsets = [0, 0], sizes = [4, 16], strides = [1, 1]} : vector<4x256xf32> to vector<4x16xf32>
    %13 = tpu.concatenate %11, %12 in 1 : vector<4x240xf32>, vector<4x16xf32> -> vector<4x256xf32>
    %14 = vector.extract_strided_slice %4 {offsets = [0, 17], sizes = [4, 239], strides = [1, 1]} : vector<4x256xf32> to vector<4x239xf32>
    %15 = vector.extract_strided_slice %4 {offsets = [0, 0], sizes = [4, 17], strides = [1, 1]} : vector<4x256xf32> to vector<4x17xf32>
    %16 = tpu.concatenate %14, %15 in 1 : vector<4x239xf32>, vector<4x17xf32> -> vector<4x256xf32>
    %17 = vector.extract_strided_slice %4 {offsets = [0, 18], sizes = [4, 238], strides = [1, 1]} : vector<4x256xf32> to vector<4x238xf32>
    %18 = vector.extract_strided_slice %4 {offsets = [0, 0], sizes = [4, 18], strides = [1, 1]} : vector<4x256xf32> to vector<4x18xf32>
    %19 = tpu.concatenate %17, %18 in 1 : vector<4x238xf32>, vector<4x18xf32> -> vector<4x256xf32>
    %20 = vector.extract_strided_slice %4 {offsets = [0, 32], sizes = [4, 224], strides = [1, 1]} : vector<4x256xf32> to vector<4x224xf32>
    %21 = vector.extract_strided_slice %4 {offsets = [0, 0], sizes = [4, 32], strides = [1, 1]} : vector<4x256xf32> to vector<4x32xf32>
    %22 = tpu.concatenate %20, %21 in 1 : vector<4x224xf32>, vector<4x32xf32> -> vector<4x256xf32>
    %23 = vector.extract_strided_slice %4 {offsets = [0, 33], sizes = [4, 223], strides = [1, 1]} : vector<4x256xf32> to vector<4x223xf32>
    %24 = vector.extract_strided_slice %4 {offsets = [0, 0], sizes = [4, 33], strides = [1, 1]} : vector<4x256xf32> to vector<4x33xf32>
    %25 = tpu.concatenate %23, %24 in 1 : vector<4x223xf32>, vector<4x33xf32> -> vector<4x256xf32>
    %26 = vector.extract_strided_slice %4 {offsets = [0, 34], sizes = [4, 222], strides = [1, 1]} : vector<4x256xf32> to vector<4x222xf32>
    %27 = vector.extract_strided_slice %4 {offsets = [0, 0], sizes = [4, 34], strides = [1, 1]} : vector<4x256xf32> to vector<4x34xf32>
    %28 = tpu.concatenate %26, %27 in 1 : vector<4x222xf32>, vector<4x34xf32> -> vector<4x256xf32>
    %29 = tpu.concatenate %4, %7, %10, %13, %16, %19, %22, %25, %28 in 0 : vector<4x256xf32>, vector<4x256xf32>, vector<4x256xf32>, vector<4x256xf32>, vector<4x256xf32>, vector<4x256xf32>, vector<4x256xf32>, vector<4x256xf32>, vector<4x256xf32> -> vector<36x256xf32>
    %cst = arith.constant dense<0.000000e+00> : vector<8x256xf32>
    %30 = tpu.matmul %1, %29, %cst {dimension_numbers = #tpu.dot_dimension_numbers<[1], [0], [0], [1], [0, 0, 1, 1], [], []>} : vector<8x36xf32>, vector<36x256xf32>, vector<8x256xf32> -> vector<8x256xf32>
    %31 = vector.extract_strided_slice %30 {offsets = [0, 1], sizes = [8, 255], strides = [1, 1]} : vector<8x256xf32> to vector<8x255xf32>
    %32 = vector.extract_strided_slice %30 {offsets = [0, 0], sizes = [8, 1], strides = [1, 1]} : vector<8x256xf32> to vector<8x1xf32>
    %33 = tpu.concatenate %31, %32 in 1 : vector<8x255xf32>, vector<8x1xf32> -> vector<8x256xf32>
    %34 = arith.maximumf %30, %33 : vector<8x256xf32>
    %35 = vector.extract_strided_slice %30 {offsets = [0, 16], sizes = [8, 240], strides = [1, 1]} : vector<8x256xf32> to vector<8x240xf32>
    %36 = vector.extract_strided_slice %30 {offsets = [0, 0], sizes = [8, 16], strides = [1, 1]} : vector<8x256xf32> to vector<8x16xf32>
    %37 = tpu.concatenate %35, %36 in 1 : vector<8x240xf32>, vector<8x16xf32> -> vector<8x256xf32>
    %38 = vector.extract_strided_slice %30 {offsets = [0, 17], sizes = [8, 239], strides = [1, 1]} : vector<8x256xf32> to vector<8x239xf32>
    %39 = vector.extract_strided_slice %30 {offsets = [0, 0], sizes = [8, 17], strides = [1, 1]} : vector<8x256xf32> to vector<8x17xf32>
    %40 = tpu.concatenate %38, %39 in 1 : vector<8x239xf32>, vector<8x17xf32> -> vector<8x256xf32>
    %41 = arith.maximumf %37, %40 : vector<8x256xf32>
    %42 = arith.maximumf %34, %41 : vector<8x256xf32>
    %43 = vector.broadcast %2 : vector<8x1xf32> to vector<8x256xf32>
    %44 = arith.addf %42, %43 : vector<8x256xf32>
    %cst_8 = arith.constant 0.000000e+00 : f32
    %45 = vector.broadcast %cst_8 : f32 to vector<8x256xf32>
    %46 = arith.maximumf %44, %45 : vector<8x256xf32>
    %cst_9 = arith.constant 0.000000e+00 : f32
    %47 = vector.broadcast %cst_9 : f32 to vector<1x16xf32>
    %48 = vector.extract_strided_slice %46 {offsets = [0, 0], sizes = [1, 256], strides = [1, 1]} : vector<8x256xf32> to vector<1x256xf32>
    %49 = vector.extract_strided_slice %3 {offsets = [0, 0, 0], sizes = [1, 256, 16], strides = [1, 1, 1]} : vector<8x256x16xf32> to vector<1x256x16xf32>
    %50 = vector.shape_cast %49 : vector<1x256x16xf32> to vector<256x16xf32>
    %cst_10 = arith.constant dense<0.000000e+00> : vector<1x16xf32>
    %51 = tpu.matmul %48, %50, %cst_10 {dimension_numbers = #tpu.dot_dimension_numbers<[1], [0], [0], [1], [0, 0, 1, 1], [], []>} : vector<1x256xf32>, vector<256x16xf32>, vector<1x16xf32> -> vector<1x16xf32>
    %52 = arith.addf %47, %51 : vector<1x16xf32>
    %53 = vector.extract_strided_slice %46 {offsets = [1, 0], sizes = [1, 256], strides = [1, 1]} : vector<8x256xf32> to vector<1x256xf32>
    %54 = vector.extract_strided_slice %3 {offsets = [1, 0, 0], sizes = [1, 256, 16], strides = [1, 1, 1]} : vector<8x256x16xf32> to vector<1x256x16xf32>
    %55 = vector.shape_cast %54 : vector<1x256x16xf32> to vector<256x16xf32>
    %cst_11 = arith.constant dense<0.000000e+00> : vector<1x16xf32>
    %56 = tpu.matmul %53, %55, %cst_11 {dimension_numbers = #tpu.dot_dimension_numbers<[1], [0], [0], [1], [0, 0, 1, 1], [], []>} : vector<1x256xf32>, vector<256x16xf32>, vector<1x16xf32> -> vector<1x16xf32>
    %57 = arith.addf %52, %56 : vector<1x16xf32>
    %58 = vector.extract_strided_slice %46 {offsets = [2, 0], sizes = [1, 256], strides = [1, 1]} : vector<8x256xf32> to vector<1x256xf32>
    %59 = vector.extract_strided_slice %3 {offsets = [2, 0, 0], sizes = [1, 256, 16], strides = [1, 1, 1]} : vector<8x256x16xf32> to vector<1x256x16xf32>
    %60 = vector.shape_cast %59 : vector<1x256x16xf32> to vector<256x16xf32>
    %cst_12 = arith.constant dense<0.000000e+00> : vector<1x16xf32>
    %61 = tpu.matmul %58, %60, %cst_12 {dimension_numbers = #tpu.dot_dimension_numbers<[1], [0], [0], [1], [0, 0, 1, 1], [], []>} : vector<1x256xf32>, vector<256x16xf32>, vector<1x16xf32> -> vector<1x16xf32>
    %62 = arith.addf %57, %61 : vector<1x16xf32>
    %63 = vector.extract_strided_slice %46 {offsets = [3, 0], sizes = [1, 256], strides = [1, 1]} : vector<8x256xf32> to vector<1x256xf32>
    %64 = vector.extract_strided_slice %3 {offsets = [3, 0, 0], sizes = [1, 256, 16], strides = [1, 1, 1]} : vector<8x256x16xf32> to vector<1x256x16xf32>
    %65 = vector.shape_cast %64 : vector<1x256x16xf32> to vector<256x16xf32>
    %cst_13 = arith.constant dense<0.000000e+00> : vector<1x16xf32>
    %66 = tpu.matmul %63, %65, %cst_13 {dimension_numbers = #tpu.dot_dimension_numbers<[1], [0], [0], [1], [0, 0, 1, 1], [], []>} : vector<1x256xf32>, vector<256x16xf32>, vector<1x16xf32> -> vector<1x16xf32>
    %67 = arith.addf %62, %66 : vector<1x16xf32>
    %68 = vector.extract_strided_slice %46 {offsets = [4, 0], sizes = [1, 256], strides = [1, 1]} : vector<8x256xf32> to vector<1x256xf32>
    %69 = vector.extract_strided_slice %3 {offsets = [4, 0, 0], sizes = [1, 256, 16], strides = [1, 1, 1]} : vector<8x256x16xf32> to vector<1x256x16xf32>
    %70 = vector.shape_cast %69 : vector<1x256x16xf32> to vector<256x16xf32>
    %cst_14 = arith.constant dense<0.000000e+00> : vector<1x16xf32>
    %71 = tpu.matmul %68, %70, %cst_14 {dimension_numbers = #tpu.dot_dimension_numbers<[1], [0], [0], [1], [0, 0, 1, 1], [], []>} : vector<1x256xf32>, vector<256x16xf32>, vector<1x16xf32> -> vector<1x16xf32>
    %72 = arith.addf %67, %71 : vector<1x16xf32>
    %73 = vector.extract_strided_slice %46 {offsets = [5, 0], sizes = [1, 256], strides = [1, 1]} : vector<8x256xf32> to vector<1x256xf32>
    %74 = vector.extract_strided_slice %3 {offsets = [5, 0, 0], sizes = [1, 256, 16], strides = [1, 1, 1]} : vector<8x256x16xf32> to vector<1x256x16xf32>
    %75 = vector.shape_cast %74 : vector<1x256x16xf32> to vector<256x16xf32>
    %cst_15 = arith.constant dense<0.000000e+00> : vector<1x16xf32>
    %76 = tpu.matmul %73, %75, %cst_15 {dimension_numbers = #tpu.dot_dimension_numbers<[1], [0], [0], [1], [0, 0, 1, 1], [], []>} : vector<1x256xf32>, vector<256x16xf32>, vector<1x16xf32> -> vector<1x16xf32>
    %77 = arith.addf %72, %76 : vector<1x16xf32>
    %78 = vector.extract_strided_slice %46 {offsets = [6, 0], sizes = [1, 256], strides = [1, 1]} : vector<8x256xf32> to vector<1x256xf32>
    %79 = vector.extract_strided_slice %3 {offsets = [6, 0, 0], sizes = [1, 256, 16], strides = [1, 1, 1]} : vector<8x256x16xf32> to vector<1x256x16xf32>
    %80 = vector.shape_cast %79 : vector<1x256x16xf32> to vector<256x16xf32>
    %cst_16 = arith.constant dense<0.000000e+00> : vector<1x16xf32>
    %81 = tpu.matmul %78, %80, %cst_16 {dimension_numbers = #tpu.dot_dimension_numbers<[1], [0], [0], [1], [0, 0, 1, 1], [], []>} : vector<1x256xf32>, vector<256x16xf32>, vector<1x16xf32> -> vector<1x16xf32>
    %82 = arith.addf %77, %81 : vector<1x16xf32>
    %83 = vector.extract_strided_slice %46 {offsets = [7, 0], sizes = [1, 256], strides = [1, 1]} : vector<8x256xf32> to vector<1x256xf32>
    %84 = vector.extract_strided_slice %3 {offsets = [7, 0, 0], sizes = [1, 256, 16], strides = [1, 1, 1]} : vector<8x256x16xf32> to vector<1x256x16xf32>
    %85 = vector.shape_cast %84 : vector<1x256x16xf32> to vector<256x16xf32>
    %cst_17 = arith.constant dense<0.000000e+00> : vector<1x16xf32>
    %86 = tpu.matmul %83, %85, %cst_17 {dimension_numbers = #tpu.dot_dimension_numbers<[1], [0], [0], [1], [0, 0, 1, 1], [], []>} : vector<1x256xf32>, vector<256x16xf32>, vector<1x16xf32> -> vector<1x16xf32>
    %87 = arith.addf %82, %86 : vector<1x16xf32>
    %88 = vector.extract_strided_slice %0 {offsets = [4, 0], sizes = [4, 256], strides = [1, 1]} : vector<8x256xf32> to vector<4x256xf32>
    %89 = vector.extract_strided_slice %88 {offsets = [0, 1], sizes = [4, 255], strides = [1, 1]} : vector<4x256xf32> to vector<4x255xf32>
    %90 = vector.extract_strided_slice %88 {offsets = [0, 0], sizes = [4, 1], strides = [1, 1]} : vector<4x256xf32> to vector<4x1xf32>
    %91 = tpu.concatenate %89, %90 in 1 : vector<4x255xf32>, vector<4x1xf32> -> vector<4x256xf32>
    %92 = vector.extract_strided_slice %88 {offsets = [0, 2], sizes = [4, 254], strides = [1, 1]} : vector<4x256xf32> to vector<4x254xf32>
    %93 = vector.extract_strided_slice %88 {offsets = [0, 0], sizes = [4, 2], strides = [1, 1]} : vector<4x256xf32> to vector<4x2xf32>
    %94 = tpu.concatenate %92, %93 in 1 : vector<4x254xf32>, vector<4x2xf32> -> vector<4x256xf32>
    %95 = vector.extract_strided_slice %88 {offsets = [0, 16], sizes = [4, 240], strides = [1, 1]} : vector<4x256xf32> to vector<4x240xf32>
    %96 = vector.extract_strided_slice %88 {offsets = [0, 0], sizes = [4, 16], strides = [1, 1]} : vector<4x256xf32> to vector<4x16xf32>
    %97 = tpu.concatenate %95, %96 in 1 : vector<4x240xf32>, vector<4x16xf32> -> vector<4x256xf32>
    %98 = vector.extract_strided_slice %88 {offsets = [0, 17], sizes = [4, 239], strides = [1, 1]} : vector<4x256xf32> to vector<4x239xf32>
    %99 = vector.extract_strided_slice %88 {offsets = [0, 0], sizes = [4, 17], strides = [1, 1]} : vector<4x256xf32> to vector<4x17xf32>
    %100 = tpu.concatenate %98, %99 in 1 : vector<4x239xf32>, vector<4x17xf32> -> vector<4x256xf32>
    %101 = vector.extract_strided_slice %88 {offsets = [0, 18], sizes = [4, 238], strides = [1, 1]} : vector<4x256xf32> to vector<4x238xf32>
    %102 = vector.extract_strided_slice %88 {offsets = [0, 0], sizes = [4, 18], strides = [1, 1]} : vector<4x256xf32> to vector<4x18xf32>
    %103 = tpu.concatenate %101, %102 in 1 : vector<4x238xf32>, vector<4x18xf32> -> vector<4x256xf32>
    %104 = vector.extract_strided_slice %88 {offsets = [0, 32], sizes = [4, 224], strides = [1, 1]} : vector<4x256xf32> to vector<4x224xf32>
    %105 = vector.extract_strided_slice %88 {offsets = [0, 0], sizes = [4, 32], strides = [1, 1]} : vector<4x256xf32> to vector<4x32xf32>
    %106 = tpu.concatenate %104, %105 in 1 : vector<4x224xf32>, vector<4x32xf32> -> vector<4x256xf32>
    %107 = vector.extract_strided_slice %88 {offsets = [0, 33], sizes = [4, 223], strides = [1, 1]} : vector<4x256xf32> to vector<4x223xf32>
    %108 = vector.extract_strided_slice %88 {offsets = [0, 0], sizes = [4, 33], strides = [1, 1]} : vector<4x256xf32> to vector<4x33xf32>
    %109 = tpu.concatenate %107, %108 in 1 : vector<4x223xf32>, vector<4x33xf32> -> vector<4x256xf32>
    %110 = vector.extract_strided_slice %88 {offsets = [0, 34], sizes = [4, 222], strides = [1, 1]} : vector<4x256xf32> to vector<4x222xf32>
    %111 = vector.extract_strided_slice %88 {offsets = [0, 0], sizes = [4, 34], strides = [1, 1]} : vector<4x256xf32> to vector<4x34xf32>
    %112 = tpu.concatenate %110, %111 in 1 : vector<4x222xf32>, vector<4x34xf32> -> vector<4x256xf32>
    %113 = tpu.concatenate %88, %91, %94, %97, %100, %103, %106, %109, %112 in 0 : vector<4x256xf32>, vector<4x256xf32>, vector<4x256xf32>, vector<4x256xf32>, vector<4x256xf32>, vector<4x256xf32>, vector<4x256xf32>, vector<4x256xf32>, vector<4x256xf32> -> vector<36x256xf32>
    %cst_18 = arith.constant dense<0.000000e+00> : vector<8x256xf32>
    %114 = tpu.matmul %1, %113, %cst_18 {dimension_numbers = #tpu.dot_dimension_numbers<[1], [0], [0], [1], [0, 0, 1, 1], [], []>} : vector<8x36xf32>, vector<36x256xf32>, vector<8x256xf32> -> vector<8x256xf32>
    %115 = vector.extract_strided_slice %114 {offsets = [0, 1], sizes = [8, 255], strides = [1, 1]} : vector<8x256xf32> to vector<8x255xf32>
    %116 = vector.extract_strided_slice %114 {offsets = [0, 0], sizes = [8, 1], strides = [1, 1]} : vector<8x256xf32> to vector<8x1xf32>
    %117 = tpu.concatenate %115, %116 in 1 : vector<8x255xf32>, vector<8x1xf32> -> vector<8x256xf32>
    %118 = arith.maximumf %114, %117 : vector<8x256xf32>
    %119 = vector.extract_strided_slice %114 {offsets = [0, 16], sizes = [8, 240], strides = [1, 1]} : vector<8x256xf32> to vector<8x240xf32>
    %120 = vector.extract_strided_slice %114 {offsets = [0, 0], sizes = [8, 16], strides = [1, 1]} : vector<8x256xf32> to vector<8x16xf32>
    %121 = tpu.concatenate %119, %120 in 1 : vector<8x240xf32>, vector<8x16xf32> -> vector<8x256xf32>
    %122 = vector.extract_strided_slice %114 {offsets = [0, 17], sizes = [8, 239], strides = [1, 1]} : vector<8x256xf32> to vector<8x239xf32>
    %123 = vector.extract_strided_slice %114 {offsets = [0, 0], sizes = [8, 17], strides = [1, 1]} : vector<8x256xf32> to vector<8x17xf32>
    %124 = tpu.concatenate %122, %123 in 1 : vector<8x239xf32>, vector<8x17xf32> -> vector<8x256xf32>
    %125 = arith.maximumf %121, %124 : vector<8x256xf32>
    %126 = arith.maximumf %118, %125 : vector<8x256xf32>
    %127 = vector.broadcast %2 : vector<8x1xf32> to vector<8x256xf32>
    %128 = arith.addf %126, %127 : vector<8x256xf32>
    %cst_19 = arith.constant 0.000000e+00 : f32
    %129 = vector.broadcast %cst_19 : f32 to vector<8x256xf32>
    %130 = arith.maximumf %128, %129 : vector<8x256xf32>
    %cst_20 = arith.constant 0.000000e+00 : f32
    %131 = vector.broadcast %cst_20 : f32 to vector<1x16xf32>
    %132 = vector.extract_strided_slice %130 {offsets = [0, 0], sizes = [1, 256], strides = [1, 1]} : vector<8x256xf32> to vector<1x256xf32>
    %133 = vector.extract_strided_slice %3 {offsets = [0, 0, 0], sizes = [1, 256, 16], strides = [1, 1, 1]} : vector<8x256x16xf32> to vector<1x256x16xf32>
    %134 = vector.shape_cast %133 : vector<1x256x16xf32> to vector<256x16xf32>
    %cst_21 = arith.constant dense<0.000000e+00> : vector<1x16xf32>
    %135 = tpu.matmul %132, %134, %cst_21 {dimension_numbers = #tpu.dot_dimension_numbers<[1], [0], [0], [1], [0, 0, 1, 1], [], []>} : vector<1x256xf32>, vector<256x16xf32>, vector<1x16xf32> -> vector<1x16xf32>
    %136 = arith.addf %131, %135 : vector<1x16xf32>
    %137 = vector.extract_strided_slice %130 {offsets = [1, 0], sizes = [1, 256], strides = [1, 1]} : vector<8x256xf32> to vector<1x256xf32>
    %138 = vector.extract_strided_slice %3 {offsets = [1, 0, 0], sizes = [1, 256, 16], strides = [1, 1, 1]} : vector<8x256x16xf32> to vector<1x256x16xf32>
    %139 = vector.shape_cast %138 : vector<1x256x16xf32> to vector<256x16xf32>
    %cst_22 = arith.constant dense<0.000000e+00> : vector<1x16xf32>
    %140 = tpu.matmul %137, %139, %cst_22 {dimension_numbers = #tpu.dot_dimension_numbers<[1], [0], [0], [1], [0, 0, 1, 1], [], []>} : vector<1x256xf32>, vector<256x16xf32>, vector<1x16xf32> -> vector<1x16xf32>
    %141 = arith.addf %136, %140 : vector<1x16xf32>
    %142 = vector.extract_strided_slice %130 {offsets = [2, 0], sizes = [1, 256], strides = [1, 1]} : vector<8x256xf32> to vector<1x256xf32>
    %143 = vector.extract_strided_slice %3 {offsets = [2, 0, 0], sizes = [1, 256, 16], strides = [1, 1, 1]} : vector<8x256x16xf32> to vector<1x256x16xf32>
    %144 = vector.shape_cast %143 : vector<1x256x16xf32> to vector<256x16xf32>
    %cst_23 = arith.constant dense<0.000000e+00> : vector<1x16xf32>
    %145 = tpu.matmul %142, %144, %cst_23 {dimension_numbers = #tpu.dot_dimension_numbers<[1], [0], [0], [1], [0, 0, 1, 1], [], []>} : vector<1x256xf32>, vector<256x16xf32>, vector<1x16xf32> -> vector<1x16xf32>
    %146 = arith.addf %141, %145 : vector<1x16xf32>
    %147 = vector.extract_strided_slice %130 {offsets = [3, 0], sizes = [1, 256], strides = [1, 1]} : vector<8x256xf32> to vector<1x256xf32>
    %148 = vector.extract_strided_slice %3 {offsets = [3, 0, 0], sizes = [1, 256, 16], strides = [1, 1, 1]} : vector<8x256x16xf32> to vector<1x256x16xf32>
    %149 = vector.shape_cast %148 : vector<1x256x16xf32> to vector<256x16xf32>
    %cst_24 = arith.constant dense<0.000000e+00> : vector<1x16xf32>
    %150 = tpu.matmul %147, %149, %cst_24 {dimension_numbers = #tpu.dot_dimension_numbers<[1], [0], [0], [1], [0, 0, 1, 1], [], []>} : vector<1x256xf32>, vector<256x16xf32>, vector<1x16xf32> -> vector<1x16xf32>
    %151 = arith.addf %146, %150 : vector<1x16xf32>
    %152 = vector.extract_strided_slice %130 {offsets = [4, 0], sizes = [1, 256], strides = [1, 1]} : vector<8x256xf32> to vector<1x256xf32>
    %153 = vector.extract_strided_slice %3 {offsets = [4, 0, 0], sizes = [1, 256, 16], strides = [1, 1, 1]} : vector<8x256x16xf32> to vector<1x256x16xf32>
    %154 = vector.shape_cast %153 : vector<1x256x16xf32> to vector<256x16xf32>
    %cst_25 = arith.constant dense<0.000000e+00> : vector<1x16xf32>
    %155 = tpu.matmul %152, %154, %cst_25 {dimension_numbers = #tpu.dot_dimension_numbers<[1], [0], [0], [1], [0, 0, 1, 1], [], []>} : vector<1x256xf32>, vector<256x16xf32>, vector<1x16xf32> -> vector<1x16xf32>
    %156 = arith.addf %151, %155 : vector<1x16xf32>
    %157 = vector.extract_strided_slice %130 {offsets = [5, 0], sizes = [1, 256], strides = [1, 1]} : vector<8x256xf32> to vector<1x256xf32>
    %158 = vector.extract_strided_slice %3 {offsets = [5, 0, 0], sizes = [1, 256, 16], strides = [1, 1, 1]} : vector<8x256x16xf32> to vector<1x256x16xf32>
    %159 = vector.shape_cast %158 : vector<1x256x16xf32> to vector<256x16xf32>
    %cst_26 = arith.constant dense<0.000000e+00> : vector<1x16xf32>
    %160 = tpu.matmul %157, %159, %cst_26 {dimension_numbers = #tpu.dot_dimension_numbers<[1], [0], [0], [1], [0, 0, 1, 1], [], []>} : vector<1x256xf32>, vector<256x16xf32>, vector<1x16xf32> -> vector<1x16xf32>
    %161 = arith.addf %156, %160 : vector<1x16xf32>
    %162 = vector.extract_strided_slice %130 {offsets = [6, 0], sizes = [1, 256], strides = [1, 1]} : vector<8x256xf32> to vector<1x256xf32>
    %163 = vector.extract_strided_slice %3 {offsets = [6, 0, 0], sizes = [1, 256, 16], strides = [1, 1, 1]} : vector<8x256x16xf32> to vector<1x256x16xf32>
    %164 = vector.shape_cast %163 : vector<1x256x16xf32> to vector<256x16xf32>
    %cst_27 = arith.constant dense<0.000000e+00> : vector<1x16xf32>
    %165 = tpu.matmul %162, %164, %cst_27 {dimension_numbers = #tpu.dot_dimension_numbers<[1], [0], [0], [1], [0, 0, 1, 1], [], []>} : vector<1x256xf32>, vector<256x16xf32>, vector<1x16xf32> -> vector<1x16xf32>
    %166 = arith.addf %161, %165 : vector<1x16xf32>
    %167 = vector.extract_strided_slice %130 {offsets = [7, 0], sizes = [1, 256], strides = [1, 1]} : vector<8x256xf32> to vector<1x256xf32>
    %168 = vector.extract_strided_slice %3 {offsets = [7, 0, 0], sizes = [1, 256, 16], strides = [1, 1, 1]} : vector<8x256x16xf32> to vector<1x256x16xf32>
    %169 = vector.shape_cast %168 : vector<1x256x16xf32> to vector<256x16xf32>
    %cst_28 = arith.constant dense<0.000000e+00> : vector<1x16xf32>
    %170 = tpu.matmul %167, %169, %cst_28 {dimension_numbers = #tpu.dot_dimension_numbers<[1], [0], [0], [1], [0, 0, 1, 1], [], []>} : vector<1x256xf32>, vector<256x16xf32>, vector<1x16xf32> -> vector<1x16xf32>
    %171 = arith.addf %166, %170 : vector<1x16xf32>
    %172 = tpu.concatenate %87, %171 in 0 : vector<1x16xf32>, vector<1x16xf32> -> vector<2x16xf32>
    %c0_29 = arith.constant 0 : index
    %c0_30 = arith.constant 0 : index
    %173 = vector.load %arg4[%c0_29, %c0_30] : memref<1x16xf32, #tpu.memory_space<vmem>>, vector<1x16xf32>
    %174 = vector.broadcast %173 : vector<1x16xf32> to vector<2x16xf32>
    %175 = arith.addf %172, %174 : vector<2x16xf32>
    %cst_31 = arith.constant dense<0xFF800000> : vector<2xf32>
    %176 = vector.multi_reduction <maximumf>, %175, %cst_31 [1] : vector<2x16xf32> to vector<2xf32>
    %177 = vector.shape_cast %176 : vector<2xf32> to vector<2x1xf32>
    %178 = vector.broadcast %177 : vector<2x1xf32> to vector<2x16xf32>
    %179 = arith.subf %175, %178 : vector<2x16xf32>
    %180 = math.exp %179 : vector<2x16xf32>
    %cst_32 = arith.constant dense<0.000000e+00> : vector<2xf32>
    %181 = vector.multi_reduction <add>, %180, %cst_32 [1] : vector<2x16xf32> to vector<2xf32>
    %182 = vector.shape_cast %181 : vector<2xf32> to vector<2x1xf32>
    %183 = vector.broadcast %182 : vector<2x1xf32> to vector<2x16xf32>
    %184 = arith.divf %180, %183 : vector<2x16xf32>
    %c0_33 = arith.constant 0 : index
    %c0_34 = arith.constant 0 : index
    %185 = vector.load %arg5[%c0_33, %c0_34] : memref<2x16xf32, #tpu.memory_space<vmem>>, vector<2x16xf32>
    tpu.vector_store %arg5[%c0_33, %c0_34], %184 {strides = array<i32>} : memref<2x16xf32, #tpu.memory_space<vmem>>, vector<2x16xf32>,
    return
  }
}

</mosaic_0001>

<bundles_post_ra>
// kernel: cnn_forward.1
= control target key start
LH: loop header
LB: loop body
LE: loop exit
PB: predicated region body
PF: predicated region fallthrough
CT: control target
= control target key end

     0   :  { %s1524_s22 = smov 94   ;;  %s3488_s0 = inlined_call_operand.vmem [shape: f32[8,256], index: 0, kind: input, shape index: {}]   ;;  %s3489_s1 = inlined_call_operand.vmem [shape: f32[8,36], index: 1, kind: input, shape index: {}]   ;;  %s3490_s2 = inlined_call_operand.vmem [shape: f32[8,1], index: 2, kind: input, shape index: {}]   ;;  %s3491_s3 = inlined_call_operand.vmem [shape: f32[8,256,16], index: 3, kind: input, shape index: {}]   ;;  %s3492_s4 = inlined_call_operand.vmem [shape: f32[1,16], index: 4, kind: input, shape index: {}]   ;;  %s3493_s5 = inlined_call_operand.hbm [shape: f32[2,16], index: 5, kind: output, shape index: {}]  }
   0x1   :  { %v1567_v0 = vld [vmem:[%s3488_s0] sm:$0xff]  ;;  %v1572_v1 = vld [vmem:[%s3488_s0 + $0x8] sm:$0xff] }
   0x2   :  { %v1378_v2 = vpack.i.bf16 %v1572_v1, %v1567_v0  ;;  %351 = vrot.lane.b32.xlu1 %v1572_v1, %s1524_s22 }
   0x3   :  { %10 = vsyncpa [#allocation3], 0  ;;  %s1525_s23 = smov 95   ;;  %s1526_s24 = smov 96   ;;  %vm296_vm0 = vcmask 1031168   ;;  %vm306_vm1 = vcmask 916480  }
   0x4   :  { %1379 = vrot.lane.b32.xlu0 %v1378_v2, %s1525_s23  ;;  %1389 = vrot.lane.b32.xlu2 %v1378_v2, %s1526_s24  ;;  %s1527_s25 = smov 110   ;;  %s1528_s26 = smov 112   ;;  %vm334_vm2 = vcmask 785408   ;;  %vm378_vm3 = vcmask 1043456   ;;  %vm344_vm4 = vcmask 777216   ;;  %vm353_vm5 = vcmask 769024  }
   0x5   :  { %s1529_s27 = smov 127   ;;  %s1530_s28 = smov 111   ;;  %vm325_vm6 = vcmask 900096   ;;  %vm287_vm7 = vcmask 1039360   ;;  %vm315_vm8 = vcmask 908288   ;;  %vm387_vm9 = vcmask 293888  }
   0x6   :  { %s1531_s29 = smov 126   ;;  %vm1311_vm10 = vcmask 1040384   ;;  %vm1318_vm11 = vcmask 123904  }
   0xa   :  { %1384 = vrot.lane.b32.xlu1 %v1378_v2, %s1527_s25 }
   0xc   :  { %349 = vrot.lane.b32.xlu0 %v1567_v0, %s1524_s22  ;;  %1394 = vrot.lane.b32.xlu2 %v1378_v2, %s1528_s26 }
  0x12   :  { %1404 = vrot.lane.b32.xlu1 %v1378_v2, %s1529_s27 }
  0x14   :  { %1399 = vrot.lane.b32.xlu0 %v1378_v2, %s1530_s28  ;;  %1409 = vrot.lane.b32.xlu2 %v1378_v2, %s1531_s29  ;;  %s1351_s29 = sshll.u32 %s3493_s5, 4  ;;  %s1352_s29 = int_to_ptr.hbm [resolvable:$true] %s1351_s29 }
  0x5e   :  { %v1390_v3 = vpop.permute.xlu2 %1389 }
  0x5f   :  { %v1392_v8 = vunpack.i.h.bf16 %v1390_v3  ;;  %v1391_v9 = vunpack.i.l.bf16 %v1390_v3 }
  0x61   :  { %v335_v18 = vsel %vm334_vm2, %v1391_v9, %v1392_v8  ;;  %v339_v19 = vsel %vm334_vm2, %v1392_v8, %v1391_v9  ;;  %v23_v8 = vld [vmem:[%s3489_s1] sm:$0xff]  ;;  %v56_v9 = vld [vmem:[%s3491_s3 + $0xf8] sm:$0xff] }
  0x62   :  { %v855_v24 = vrot.slane %v335_v18, 4  ;;  %v856_v25 = vrot.slane %v339_v19, 4 }
  0x66   :  { %v1395_v4 = vpop.permute.xlu2 %1394 }
  0x67   :  { %v1397_v5 = vunpack.i.h.bf16 %v1395_v4  ;;  %v1396_v6 = vunpack.i.l.bf16 %v1395_v4 }
  0x69   :  { %v1584_v13 = vsel %vm306_vm1, %v1396_v6, %v1397_v5  ;;  %v1589_v15 = vsel %vm306_vm1, %v1397_v5, %v1396_v6 }
  0x6a   :  { %v364_v48 = vrot.slane %v1584_v13, 4  ;;  %v365_v49 = vrot.slane %v1589_v15, 4 }
  0x6e   :  { %v1410_v7 = vpop.permute.xlu2 %1409 }
  0x6f   :  { %v1412_v10 = vunpack.i.h.bf16 %v1410_v7  ;;  %v1411_v11 = vunpack.i.l.bf16 %v1410_v7 }
  0x71   :  { %v1581_v12 = vsel %vm296_vm0, %v1411_v11, %v1412_v10  ;;  %v1586_v14 = vsel %vm296_vm0, %v1412_v10, %v1411_v11  ;;  %v72_v10 = vld [vmem:[%s3491_s3 + $0x178] sm:$0xff] }
  0x72   :  { %v845_v16 = vrot.slane %v1581_v12, 4  ;;  %v846_v17 = vrot.slane %v1586_v14, 4  ;;  %v381_v2 = vsel %vm378_vm3, %v1581_v12, %v364_v48  ;;  %v382_v3 = vsel %vm378_vm3, %v1586_v14, %v365_v49  ;;  %v88_v11 = vld [vmem:[%s3491_s3 + $0x1f8] sm:$0xff]  ;;  %v39_v12 = vld [vmem:[%s3491_s3 + $0x70] sm:$0xff]  ;;  %486 = vmatpush.msra.mxu2 %v72_v10 }
  0x73   :  { %506 = vmatpush.msra.mxu3 %v88_v11  ;;  %v71_v14 = vld [vmem:[%s3491_s3 + $0x170] sm:$0xff]  ;;  %v32_v48 = vld [vmem:[%s3491_s3 + $0x38] sm:$0xff] }
  0x74   :  { %v352_v20 = vpop.permute.xlu1 %351  ;;  %v1595_v21 = vsel %vm378_vm3, %v845_v16, %v1584_v13  ;;  %v1599_v22 = vsel %vm378_vm3, %v846_v17, %v1589_v15  ;;  %v55_v13 = vld [vmem:[%s3491_s3 + $0xf0] sm:$0xff]  ;;  %v38_v16 = vld [vmem:[%s3491_s3 + $0x68] sm:$0xff]  ;;  %487 = vmatpush.msra.mxu2 %v71_v14  ;;  %v48_v49 = vld [vmem:[%s3491_s3 + $0xb8] sm:$0xff] }
  0x75   :  { %v87_v15 = vld [vmem:[%s3491_s3 + $0x1f0] sm:$0xff]  ;;  %v54_v17 = vld [vmem:[%s3491_s3 + $0xe8] sm:$0xff] }
  0x76   :  { %v1380_v23 = vpop.permute.xlu0 %1379  ;;  %507 = vmatpush.msra.mxu3 %v87_v15  ;;  %v43_v10 = vld [vmem:[%s3491_s3 + $0x90] sm:$0xff]  ;;  %v42_v14 = vld [vmem:[%s3491_s3 + $0x88] sm:$0xff] }
  0x77   :  { %v1382_v26 = vunpack.i.h.bf16 %v1380_v23  ;;  %v1381_v27 = vunpack.i.l.bf16 %v1380_v23  ;;  %v53_v23 = vld [vmem:[%s3491_s3 + $0xe0] sm:$0xff]  ;;  %v59_v11 = vld [vmem:[%s3491_s3 + $0x110] sm:$0xff]  ;;  %v58_v15 = vld [vmem:[%s3491_s3 + $0x108] sm:$0xff] }
  0x79   :  { %v345_v28 = vsel %vm344_vm4, %v1381_v27, %v1382_v26  ;;  %v348_v29 = vsel %vm344_vm4, %v1382_v26, %v1381_v27  ;;  %v36_v26 = vld [vmem:[%s3491_s3 + $0x58] sm:$0xff] }
  0x7a   :  { %v1602_v30 = vsel %vm378_vm3, %v855_v24, %v345_v28  ;;  %v1605_v31 = vsel %vm378_vm3, %v856_v25, %v348_v29  ;;  %v374_v33 = vrot.slane %v345_v28, 4  ;;  %v375_v34 = vrot.slane %v348_v29, 4  ;;  %v69_v24 = vld [vmem:[%s3491_s3 + $0x160] sm:$0xff]  ;;  %v52_v27 = vld [vmem:[%s3491_s3 + $0xd8] sm:$0xff] }
  0x7b   :  { %v85_v25 = vld [vmem:[%s3491_s3 + $0x1e0] sm:$0xff]  ;;  %v68_v28 = vld [vmem:[%s3491_s3 + $0x158] sm:$0xff] }
  0x7c   :  { %v1385_v32 = vpop.permute.xlu1 %1384  ;;  %v385_v40 = vsel %vm378_vm3, %v335_v18, %v374_v33  ;;  %v386_v41 = vsel %vm378_vm3, %v339_v19, %v375_v34  ;;  %v70_v18 = vld [vmem:[%s3491_s3 + $0x168] sm:$0xff]  ;;  %v84_v29 = vld [vmem:[%s3491_s3 + $0x1d8] sm:$0xff]  ;;  %v51_v33 = vld [vmem:[%s3491_s3 + $0xd0] sm:$0xff] }
  0x7d   :  { %v1387_v38 = vunpack.i.h.bf16 %v1385_v32  ;;  %v1386_v39 = vunpack.i.l.bf16 %v1385_v32  ;;  %v86_v19 = vld [vmem:[%s3491_s3 + $0x1e8] sm:$0xff]  ;;  %488 = vmatpush.msra.mxu2 %v70_v18  ;;  %v35_v32 = vld [vmem:[%s3491_s3 + $0x50] sm:$0xff]  ;;  %v41_v18 = vld [vmem:[%s3491_s3 + $0x80] sm:$0xff] }
  0x7e   :  { %v350_v35 = vpop.permute.xlu0 %349  ;;  %508 = vmatpush.msra.mxu3 %v86_v19  ;;  %v67_v34 = vld [vmem:[%s3491_s3 + $0x150] sm:$0xff]  ;;  %v136_v19 = vld [vmem:[%s3491_s3 + $0x378] sm:$0xff] }
  0x7f   :  { %v1607_v36 = vsel %vm353_vm5, %v350_v35, %v352_v20  ;;  %v1609_v37 = vsel %vm353_vm5, %v352_v20, %v350_v35  ;;  %v326_v45 = vsel %vm325_vm6, %v1386_v39, %v1387_v38  ;;  %v329_v46 = vsel %vm325_vm6, %v1387_v38, %v1386_v39  ;;  %v37_v20 = vld [vmem:[%s3491_s3 + $0x60] sm:$0xff]  ;;  %489 = vmatpush.msra.mxu2 %v69_v24  ;;  %v83_v35 = vld [vmem:[%s3491_s3 + $0x1d0] sm:$0xff]  ;;  %v34_v38 = vld [vmem:[%s3491_s3 + $0x48] sm:$0xff] }
  0x80   :  { %1360 = vmatpush.msk.msra.mxu0 %vm378_vm3, %v1607_v36  ;;  %1362 = vmatpush.msk.msra.mxu1 %vm378_vm3, %v1609_v37  ;;  %v369_v54 = vrot.slane %v326_v45, 4  ;;  %v370_v55 = vrot.slane %v329_v46, 4  ;;  %v50_v39 = vld [vmem:[%s3491_s3 + $0xc8] sm:$0xff]  ;;  %v73_v24 = vld [vmem:[%s3491_s3 + $0x180] sm:$0xff] }
  0x81   :  { %509 = vmatpush.msra.mxu3 %v85_v25  ;;  %490 = vmatpush.msra.mxu2 %v68_v28  ;;  %v104_v25 = vld [vmem:[%s3491_s3 + $0x278] sm:$0xff]  ;;  %v151_v28 = vld [vmem:[%s3491_s3 + $0x3f0] sm:$0xff] }
  0x82   :  { %408 = vmatpush.msra.mxu0 %v385_v40  ;;  %428 = vmatpush.msra.mxu1 %v386_v41  ;;  %v66_v40 = vld [vmem:[%s3491_s3 + $0x148] sm:$0xff] }
  0x83   :  { %510 = vmatpush.msra.mxu3 %v84_v29  ;;  %v82_v41 = vld [vmem:[%s3491_s3 + $0x1c8] sm:$0xff]  ;;  %491 = vmatpush.msra.mxu2 %v67_v34  ;;  %v1882_v29 = vld [vmem:[%s3491_s3 + $0x270] sm:$0xff] }
  0x84   :  { %v1405_v42 = vpop.permute.xlu1 %1404  ;;  %v150_v34 = vld [vmem:[%s3491_s3 + $0x3e8] sm:$0xff] }
  0x85   :  { %v1407_v43 = vunpack.i.h.bf16 %v1405_v42  ;;  %v1406_v44 = vunpack.i.l.bf16 %v1405_v42  ;;  %511 = vmatpush.msra.mxu3 %v83_v35  ;;  %v33_v42 = vld [vmem:[%s3491_s3 + $0x40] sm:$0xff]  ;;  %492 = vmatpush.msra.mxu2 %v66_v40  ;;  %v1898_v35 = vld [vmem:[%s3491_s3 + $0x268] sm:$0xff] }
  0x86   :  { %v1400_v47 = vpop.permute.xlu0 %1399  ;;  %v149_v40 = vld [vmem:[%s3491_s3 + $0x3e0] sm:$0xff] }
  0x87   :  { %v1402_v50 = vunpack.i.h.bf16 %v1400_v47  ;;  %v1401_v51 = vunpack.i.l.bf16 %v1400_v47  ;;  %v1620_v52 = vsel %vm287_vm7, %v1406_v44, %v1407_v43  ;;  %v1623_v53 = vsel %vm287_vm7, %v1407_v43, %v1406_v44  ;;  %512 = vmatpush.msra.mxu3 %v82_v41  ;;  %v81_v47 = vld [vmem:[%s3491_s3 + $0x1c0] sm:$0xff] }
  0x88   :  { %v359_v56 = vrot.slane %v1620_v52, 4  ;;  %v360_v57 = vrot.slane %v1623_v53, 4  ;;  %v1916_v41 = vld [vmem:[%s3491_s3 + $0x260] sm:$0xff] }
  0x89   :  { %v316_v58 = vsel %vm315_vm8, %v1401_v51, %v1402_v50  ;;  %v320_v59 = vsel %vm315_vm8, %v1402_v50, %v1401_v51  ;;  %513 = vmatpush.msra.mxu3 %v81_v47  ;;  %v24_v50 = vld [vmem:[%s3490_s2] sm:$0xff]  ;;  %v64_v51 = vld [vmem:[%s3491_s3 + $0x138] sm:$0xff] }
  0x8a   :  { %v383_v60 = vsel %vm378_vm3, %v316_v58, %v369_v54  ;;  %v850_v61 = vrot.slane %v316_v58, 4  ;;  %v384_v62 = vsel %vm378_vm3, %v320_v59, %v370_v55  ;;  %v851_v63 = vrot.slane %v320_v59, 4  ;;  %v80_v54 = vld [vmem:[%s3491_s3 + $0x1b8] sm:$0xff]  ;;  %v31_v55 = vld [vmem:[%s3491_s3 + $0x30] sm:$0xff]  ;;  %v30_v59 = vld [vmem:[%s3491_s3 + $0x28] sm:$0xff] }
  0x8b   :  { %409 = vmatpush.msra.mxu0 %v383_v60  ;;  %429 = vmatpush.msra.mxu1 %v384_v62  ;;  %v379_v4 = vsel %vm378_vm3, %v1567_v0, %v359_v56  ;;  %v380_v5 = vsel %vm378_vm3, %v1572_v1, %v360_v57  ;;  %v1532_v0 = vmov 0   ;;  %v40_v1 = vld [vmem:[%s3491_s3 + $0x78] sm:$0xff]  ;;  %v47_v56 = vld [vmem:[%s3491_s3 + $0xb0] sm:$0xff]  ;;  %v46_v60 = vld [vmem:[%s3491_s3 + $0xa8] sm:$0xff] }
  0x8c   :  { %v1640_v6 = vsel %vm378_vm3, %v850_v61, %v326_v45  ;;  %v1643_v7 = vsel %vm378_vm3, %v851_v63, %v329_v46  ;;  %1413 = vset.pattern.permute.xlu0 %v1532_v0  ;;  %v49_v45 = vld [vmem:[%s3491_s3 + $0xc0] sm:$0xff]  ;;  %514 = vmatpush.msra.mxu3 %v80_v54  ;;  %v63_v57 = vld [vmem:[%s3491_s3 + $0x130] sm:$0xff]  ;;  %v62_v61 = vld [vmem:[%s3491_s3 + $0x128] sm:$0xff] }
  0x8d   :  { %410 = vmatpush.msra.mxu0 %v381_v2  ;;  %430 = vmatpush.msra.mxu1 %v382_v3  ;;  %v65_v46 = vld [vmem:[%s3491_s3 + $0x140] sm:$0xff]  ;;  %v79_v58 = vld [vmem:[%s3491_s3 + $0x1b0] sm:$0xff]  ;;  %v78_v62 = vld [vmem:[%s3491_s3 + $0x1a8] sm:$0xff] }
  0x8e   :  { %493 = vmatpush.msra.mxu2 %v65_v46  ;;  %515 = vmatpush.msra.mxu3 %v79_v58  ;;  %v29_v63 = vld [vmem:[%s3491_s3 + $0x20] sm:$0xff]  ;;  %v60_v0 = vld [vmem:[%s3491_s3 + $0x118] sm:$0xff]  ;;  %v1965_v54 = vld [vmem:[%s3491_s3 + $0x2d0] sm:$0xff] }
  0x8f   :  { %411 = vmatpush.msra.mxu0 %v379_v4  ;;  %431 = vmatpush.msra.mxu1 %v380_v5  ;;  %v45_v2 = vld [vmem:[%s3491_s3 + $0xa0] sm:$0xff]  ;;  %v28_v5 = vld [vmem:[%s3491_s3 + $0x18] sm:$0xff]  ;;  %v1987_v58 = vld [vmem:[%s3491_s3 + $0x2c8] sm:$0xff] }
  0x90   :  { %1361 = vmatmul.msk.f32.vlgmr.msra.gmra.mxu0 %vm387_vm9, %v23_v8  ;;  %1363 = vmatmul.msk.f32.vlgmr.msra.gmra.mxu1 %vm387_vm9, %v23_v8  ;;  %v61_v3 = vld [vmem:[%s3491_s3 + $0x120] sm:$0xff]  ;;  %v44_v8 = vld [vmem:[%s3491_s3 + $0x98] sm:$0xff] }
  0x91   :  { %526 = vmatpush.msrb.mxu0 %v40_v1  ;;  %546 = vmatpush.msrb.mxu1 %v56_v9  ;;  %v77_v4 = vld [vmem:[%s3491_s3 + $0x1a0] sm:$0xff]  ;;  %v76_v1 = vld [vmem:[%s3491_s3 + $0x198] sm:$0xff]  ;;  %v27_v9 = vld [vmem:[%s3491_s3 + $0x10] sm:$0xff] }
  0x92   :  { %494 = vmatpush.msra.mxu2 %v64_v51  ;;  %516 = vmatpush.msra.mxu3 %v78_v62  ;;  %v148_v46 = vld [vmem:[%s3491_s3 + $0x3d8] sm:$0xff]  ;;  %v1960_v51 = vld [vmem:[%s3491_s3 + $0x250] sm:$0xff]  ;;  %v2011_v62 = vld [vmem:[%s3491_s3 + $0x2c0] sm:$0xff] }
  0x93   :  { %527 = vmatpush.msrb.mxu0 %v39_v12  ;;  %547 = vmatpush.msrb.mxu1 %v55_v13  ;;  %v75_v12 = vld [vmem:[%s3491_s3 + $0x190] sm:$0xff]  ;;  %v26_v13 = vld [vmem:[%s3491_s3 + $0x8] sm:$0xff]  ;;  %v1934_v47 = vld [vmem:[%s3491_s3 + $0x258] sm:$0xff] }
  0x94   :  { %495 = vmatpush.msra.mxu2 %v63_v57  ;;  %517 = vmatpush.msra.mxu3 %v77_v4  ;;  %v1982_v57 = vld [vmem:[%s3491_s3 + $0x248] sm:$0xff]  ;;  %v2033_v4 = vld [vmem:[%s3491_s3 + $0x2b8] sm:$0xff] }
  0x95   :  { %528 = vmatpush.msrb.mxu0 %v38_v16  ;;  %548 = vmatpush.msrb.mxu1 %v54_v17  ;;  %v74_v16 = vld [vmem:[%s3491_s3 + $0x188] sm:$0xff]  ;;  %v25_v17 = vld [vmem:[%s3491_s3] sm:$0xff] }
  0x96   :  { %496 = vmatpush.msra.mxu2 %v62_v61  ;;  %518 = vmatpush.msra.mxu3 %v76_v1  ;;  %v2004_v61 = vld [vmem:[%s3491_s3 + $0x240] sm:$0xff]  ;;  %v2061_v1 = vld [vmem:[%s3491_s3 + $0x2b0] sm:$0xff] }
  0x97   :  { %529 = vmatpush.msrb.mxu0 %v37_v20  ;;  %549 = vmatpush.msrb.mxu1 %v53_v23  ;;  %v152_v20 = vld [vmem:[%s3491_s3 + $0x3f8] sm:$0xff]  ;;  %v57_v23 = vld [vmem:[%s3491_s3 + $0x100] sm:$0xff] }
  0x98   :  { %497 = vmatpush.msra.mxu2 %v61_v3  ;;  %519 = vmatpush.msra.mxu3 %v75_v12  ;;  %v2028_v3 = vld [vmem:[%s3491_s3 + $0x238] sm:$0xff]  ;;  %v2085_v12 = vld [vmem:[%s3491_s3 + $0x2a8] sm:$0xff] }
  0x99   :  { %530 = vmatpush.msrb.mxu0 %v36_v26  ;;  %550 = vmatpush.msrb.mxu1 %v52_v27  ;;  %v120_v26 = vld [vmem:[%s3491_s3 + $0x2f8] sm:$0xff]  ;;  %v135_v27 = vld [vmem:[%s3491_s3 + $0x370] sm:$0xff] }
  0x9a   :  { %498 = vmatpush.msra.mxu2 %v60_v0  ;;  %520 = vmatpush.msra.mxu3 %v74_v16  ;;  %v2056_v0 = vld [vmem:[%s3491_s3 + $0x230] sm:$0xff]  ;;  %v2107_v16 = vld [vmem:[%s3491_s3 + $0x2a0] sm:$0xff] }
  0x9b   :  { %531 = vmatpush.msrb.mxu0 %v35_v32  ;;  %551 = vmatpush.msrb.mxu1 %v51_v33  ;;  %v1887_v32 = vld [vmem:[%s3491_s3 + $0x2f0] sm:$0xff]  ;;  %v134_v33 = vld [vmem:[%s3491_s3 + $0x368] sm:$0xff] }
  0x9c   :  { %499 = vmatpush.msra.mxu2 %v59_v11  ;;  %521 = vmatpush.msra.mxu3 %v73_v24  ;;  %v2080_v11 = vld [vmem:[%s3491_s3 + $0x228] sm:$0xff]  ;;  %v2141_v24 = vld [vmem:[%s3491_s3 + $0x390] sm:$0xff] }
  0x9d   :  { %532 = vmatpush.msrb.mxu0 %v34_v38  ;;  %552 = vmatpush.msrb.mxu1 %v50_v39  ;;  %v1903_v38 = vld [vmem:[%s3491_s3 + $0x2e8] sm:$0xff]  ;;  %v133_v39 = vld [vmem:[%s3491_s3 + $0x360] sm:$0xff]  ;;  %3638 = vst [vmem:[#allocation14_spill] sm:$0xff] %v2141_v24 }
  0x9e   :  { %500 = vmatpush.msra.mxu2 %v58_v15  ;;  %590 = vmatpush.msrb.mxu3 %v120_v26  ;;  %v2102_v15 = vld [vmem:[%s3491_s3 + $0x220] sm:$0xff]  ;;  %v2157_v26 = vld [vmem:[%s3491_s3 + $0x290] sm:$0xff] }
  0x9f   :  { %533 = vmatpush.msrb.mxu0 %v33_v42  ;;  %553 = vmatpush.msrb.mxu1 %v49_v45  ;;  %v1921_v42 = vld [vmem:[%s3491_s3 + $0x2e0] sm:$0xff]  ;;  %v132_v45 = vld [vmem:[%s3491_s3 + $0x358] sm:$0xff]  ;;  %3640 = vst [vmem:[#allocation16_spill] sm:$0xff] %v2157_v26 }
  0xa0   :  { %501 = vmatpush.msra.mxu2 %v57_v23  ;;  %591 = vmatpush.msrb.mxu3 %v1887_v32  ;;  %v2136_v23 = vld [vmem:[%s3491_s3 + $0x310] sm:$0xff] }
  0xa1   :  { %534 = vmatpush.msrb.mxu0 %v32_v48  ;;  %554 = vmatpush.msrb.mxu1 %v48_v49  ;;  %v1939_v48 = vld [vmem:[%s3491_s3 + $0x2d8] sm:$0xff]  ;;  %v1946_v49 = vld [vmem:[%s3491_s3 + $0x3d0] sm:$0xff]  ;;  %3637 = vst [vmem:[#allocation13_spill] sm:$0xff] %v2136_v23 }
  0xa2   :  { %570 = vmatpush.msrb.mxu2 %v104_v25  ;;  %592 = vmatpush.msrb.mxu3 %v1903_v38  ;;  %v2152_v25 = vld [vmem:[%s3491_s3 + $0x210] sm:$0xff] }
  0xa3   :  { %535 = vmatpush.msrb.mxu0 %v31_v55  ;;  %555 = vmatpush.msrb.mxu1 %v47_v56  ;;  %v1970_v55 = vld [vmem:[%s3491_s3 + $0x348] sm:$0xff]  ;;  %3639 = vst [vmem:[#allocation15_spill] sm:$0xff] %v2152_v25 }
  0xa4   :  { %571 = vmatpush.msrb.mxu2 %v1882_v29  ;;  %593 = vmatpush.msrb.mxu3 %v1921_v42  ;;  %v1977_v56 = vld [vmem:[%s3491_s3 + $0x3c8] sm:$0xff] }
  0xa5   :  { %536 = vmatpush.msrb.mxu0 %v30_v59  ;;  %556 = vmatpush.msrb.mxu1 %v46_v60  ;;  %v1994_v59 = vld [vmem:[%s3491_s3 + $0x340] sm:$0xff] }
  0xa6   :  { %572 = vmatpush.msrb.mxu2 %v1898_v35  ;;  %594 = vmatpush.msrb.mxu3 %v1939_v48  ;;  %v1999_v60 = vld [vmem:[%s3491_s3 + $0x3c0] sm:$0xff] }
  0xa7   :  { %537 = vmatpush.msrb.mxu0 %v29_v63  ;;  %557 = vmatpush.msrb.mxu1 %v45_v2  ;;  %v2016_v63 = vld [vmem:[%s3491_s3 + $0x338] sm:$0xff] }
  0xa8   :  { %573 = vmatpush.msrb.mxu2 %v1916_v41  ;;  %595 = vmatpush.msrb.mxu3 %v1965_v54  ;;  %v2021_v2 = vld [vmem:[%s3491_s3 + $0x3b8] sm:$0xff] }
  0xa9   :  { %538 = vmatpush.msrb.mxu0 %v28_v5  ;;  %558 = vmatpush.msrb.mxu1 %v44_v8  ;;  %v2040_v5 = vld [vmem:[%s3491_s3 + $0x330] sm:$0xff] }
  0xaa   :  { %574 = vmatpush.msrb.mxu2 %v1934_v47  ;;  %596 = vmatpush.msrb.mxu3 %v1987_v58  ;;  %v2045_v8 = vld [vmem:[%s3491_s3 + $0x3b0] sm:$0xff] }
  0xab   :  { %539 = vmatpush.msrb.mxu0 %v27_v9  ;;  %559 = vmatpush.msrb.mxu1 %v43_v10  ;;  %v2066_v9 = vld [vmem:[%s3491_s3 + $0x328] sm:$0xff] }
  0xac   :  { %575 = vmatpush.msrb.mxu2 %v1960_v51  ;;  %597 = vmatpush.msrb.mxu3 %v2011_v62  ;;  %3629 = vst [vmem:[#allocation5_spill] sm:$0xff] %v2066_v9  ;;  %v2073_v10 = vld [vmem:[%s3491_s3 + $0x3a8] sm:$0xff] }
  0xad   :  { %540 = vmatpush.msrb.mxu0 %v26_v13  ;;  %560 = vmatpush.msrb.mxu1 %v42_v14  ;;  %3630 = vst [vmem:[#allocation6_spill] sm:$0xff] %v2073_v10  ;;  %v2090_v13 = vld [vmem:[%s3491_s3 + $0x320] sm:$0xff] }
  0xae   :  { %576 = vmatpush.msrb.mxu2 %v1982_v57  ;;  %598 = vmatpush.msrb.mxu3 %v2033_v4  ;;  %3631 = vst [vmem:[#allocation7_spill] sm:$0xff] %v2090_v13  ;;  %v2097_v14 = vld [vmem:[%s3491_s3 + $0x3a0] sm:$0xff] }
  0xaf   :  { %541 = vmatpush.msrb.mxu0 %v25_v17  ;;  %561 = vmatpush.msrb.mxu1 %v41_v18  ;;  %3632 = vst [vmem:[#allocation8_spill] sm:$0xff] %v2097_v14  ;;  %v2114_v17 = vld [vmem:[%s3491_s3 + $0x318] sm:$0xff] }
  0xb0   :  { %577 = vmatpush.msrb.mxu2 %v2004_v61  ;;  %599 = vmatpush.msrb.mxu3 %v2061_v1  ;;  %3633 = vst [vmem:[#allocation9_spill] sm:$0xff] %v2114_v17  ;;  %v2119_v18 = vld [vmem:[%s3491_s3 + $0x398] sm:$0xff] }
  0xb1   :  { %615 = vmatpush.msra.mxu0 %v136_v19  ;;  %635 = vmatpush.msra.mxu1 %v152_v20  ;;  %3634 = vst [vmem:[#allocation10_spill] sm:$0xff] %v2119_v18  ;;  %v2124_v19 = vld [vmem:[%s3491_s3 + $0x218] sm:$0xff] }
  0xb2   :  { %578 = vmatpush.msrb.mxu2 %v2028_v3  ;;  %600 = vmatpush.msrb.mxu3 %v2085_v12  ;;  %3635 = vst [vmem:[#allocation11_spill] sm:$0xff] %v2124_v19  ;;  %v2131_v20 = vld [vmem:[%s3491_s3 + $0x298] sm:$0xff] }
  0xb3   :  { %616 = vmatpush.msra.mxu0 %v135_v27  ;;  %636 = vmatpush.msra.mxu1 %v151_v28  ;;  %3636 = vst [vmem:[#allocation12_spill] sm:$0xff] %v2131_v20  ;;  %v2162_v27 = vld [vmem:[%s3491_s3 + $0x308] sm:$0xff] }
  0xb4   :  { %579 = vmatpush.msrb.mxu2 %v2056_v0  ;;  %601 = vmatpush.msrb.mxu3 %v2107_v16  ;;  %3641 = vst [vmem:[#allocation17_spill] sm:$0xff] %v2162_v27  ;;  %v2169_v28 = vld [vmem:[%s3491_s3 + $0x388] sm:$0xff] }
  0xb5   :  { %617 = vmatpush.msra.mxu0 %v134_v33  ;;  %637 = vmatpush.msra.mxu1 %v150_v34  ;;  %3642 = vst [vmem:[#allocation18_spill] sm:$0xff] %v2169_v28  ;;  %v2176_v33 = vld [vmem:[%s3491_s3 + $0x208] sm:$0xff] }
  0xb6   :  { %580 = vmatpush.msrb.mxu2 %v2080_v11  ;;  %602 = vmatpush.msrb.mxu3 %v2131_v20  ;;  %3643 = vst [vmem:[#allocation19_spill] sm:$0xff] %v2176_v33  ;;  %v2181_v34 = vld [vmem:[%s3491_s3 + $0x288] sm:$0xff] }
  0xb7   :  { %618 = vmatpush.msra.mxu0 %v133_v39  ;;  %638 = vmatpush.msra.mxu1 %v149_v40  ;;  %3644 = vst [vmem:[#allocation20_spill] sm:$0xff] %v2181_v34  ;;  %v2186_v39 = vld [vmem:[%s3491_s3 + $0x300] sm:$0xff] }
  0xb8   :  { %581 = vmatpush.msrb.mxu2 %v2102_v15  ;;  %603 = vmatpush.msrb.mxu3 %v2157_v26  ;;  %3645 = vst [vmem:[#allocation21_spill] sm:$0xff] %v2186_v39  ;;  %v2193_v40 = vld [vmem:[%s3491_s3 + $0x380] sm:$0xff] }
  0xb9   :  { %619 = vmatpush.msra.mxu0 %v132_v45  ;;  %639 = vmatpush.msra.mxu1 %v148_v46  ;;  %3646 = vst [vmem:[#allocation22_spill] sm:$0xff] %v2193_v40  ;;  %v2200_v45 = vld [vmem:[%s3491_s3 + $0x200] sm:$0xff] }
  0xba   :  { %582 = vmatpush.msrb.mxu2 %v2124_v19  ;;  %604 = vmatpush.msrb.mxu3 %v2181_v34  ;;  %3647 = vst [vmem:[#allocation23_spill] sm:$0xff] %v2200_v45  ;;  %v2205_v46 = vld [vmem:[%s3491_s3 + $0x280] sm:$0xff] }
  0xbb   :  { %640 = vmatpush.msra.mxu1 %v1946_v49  ;;  %3648 = vst [vmem:[#allocation24_spill] sm:$0xff] %v2205_v46 }
  0xbc   :  { %583 = vmatpush.msrb.mxu2 %v2152_v25  ;;  %605 = vmatpush.msrb.mxu3 %v2205_v46 }
  0xbd   :  { %641 = vmatpush.msra.mxu1 %v1977_v56 }
  0xbe   :  { %584 = vmatpush.msrb.mxu2 %v2176_v33 }
  0xbf   :  { %642 = vmatpush.msra.mxu1 %v1999_v60 }
  0xc0   :  { %585 = vmatpush.msrb.mxu2 %v2200_v45 }
  0xc1   :  { %643 = vmatpush.msra.mxu1 %v2021_v2 }
  0xc3   :  { %644 = vmatpush.msra.mxu1 %v2045_v8 }
  0xc5   :  { %645 = vmatpush.msra.mxu1 %v2073_v10 }
  0xc7   :  { %646 = vmatpush.msra.mxu1 %v2097_v14 }
  0xc9   :  { %647 = vmatpush.msra.mxu1 %v2119_v18 }
  0xcb   :  { %648 = vmatpush.msra.mxu1 %v2141_v24 }
  0xcd   :  { %649 = vmatpush.msra.mxu1 %v2169_v28 }
  0xcf   :  { %650 = vmatpush.msra.mxu1 %v2193_v40 }
 0x10d   :  { %v1737_v43 = vpop.f32.mrf.mxu0  ;;  %v1739_v44 = vpop.f32.mrf.mxu1 }
 0x10e   :  { %440 = vrot.lane.b32.xlu1 %v1739_v44, %s1529_s27  ;;  %449 = vrot.lane.b32.xlu2 %v1737_v43, %s1528_s26 }
 0x10f   :  { %438 = vrot.lane.b32.xlu0 %v1737_v43, %s1529_s27 }
 0x116   :  { %458 = vrot.lane.b32.xlu1 %v1737_v43, %s1530_s28  ;;  %460 = vrot.lane.b32.xlu2 %v1739_v44, %s1530_s28 }
 0x117   :  { %451 = vrot.lane.b32.xlu0 %v1739_v44, %s1528_s26 }
 0x11f   :  { %473 = vperm.xlu0 %1413, %v24_v50   ;;  %v1951_v50 = vld [vmem:[%s3491_s3 + $0x350] sm:$0xff] }
 0x120   :  { %620 = vmatpush.msra.mxu0 %v1951_v50 }
 0x122   :  { %621 = vmatpush.msra.mxu0 %v1970_v55 }
 0x124   :  { %622 = vmatpush.msra.mxu0 %v1994_v59 }
 0x126   :  { %623 = vmatpush.msra.mxu0 %v2016_v63 }
 0x128   :  { %624 = vmatpush.msra.mxu0 %v2040_v5 }
 0x12a   :  { %625 = vmatpush.msra.mxu0 %v2066_v9 }
 0x12c   :  { %626 = vmatpush.msra.mxu0 %v2090_v13 }
 0x12e   :  { %627 = vmatpush.msra.mxu0 %v2114_v17 }
 0x130   :  { %628 = vmatpush.msra.mxu0 %v2136_v23 }
 0x132   :  { %629 = vmatpush.msra.mxu0 %v2162_v27 }
 0x134   :  { %630 = vmatpush.msra.mxu0 %v2186_v39 }
 0x168   :  { %v450_v28 = vpop.permute.xlu2 %449 }
 0x170   :  { %v461_v39 = vpop.permute.xlu2 %460 }
 0x180   :  { %v441_v27 = vpop.permute.xlu1 %440 }
 0x181   :  { %v439_v24 = vpop.permute.xlu0 %438 }
 0x182   :  { %v442_v14 = vsel %vm287_vm7, %v439_v24, %v441_v27  ;;  %v446_v45 = vsel %vm287_vm7, %v441_v27, %v439_v24  ;;  %v2259_v24 = vld [vmem:[%s3491_s3 + $0x5f0] sm:$0xff]  ;;  %v2276_v27 = vld [vmem:[%s3491_s3 + $0x568] sm:$0xff] }
 0x183   :  { %v447_v26 = vmax.f32 %v1737_v43, %v442_v14  ;;  %v448_v25 = vmax.f32 %v1739_v44, %v446_v45  ;;  %v2233_v43 = vld [vmem:[%s3491_s3 + $0x5f8] sm:$0xff]  ;;  %v2254_v14 = vld [vmem:[%s3491_s3 + $0x570] sm:$0xff]  ;;  %v2305_v45 = vld [vmem:[%s3491_s3 + $0x5e0] sm:$0xff] }
 0x184   :  { %3653 = vst [vmem:[#allocation29_spill] sm:$0xff] %v2305_v45 }
 0x188   :  { %v459_v23 = vpop.permute.xlu1 %458 }
 0x189   :  { %v462_v40 = vsel %vm315_vm8, %v459_v23, %v461_v39  ;;  %v466_v18 = vsel %vm315_vm8, %v461_v39, %v459_v23  ;;  %v452_v17 = vpop.permute.xlu0 %451 }
 0x18a   :  { %v453_v34 = vsel %vm306_vm1, %v450_v28, %v452_v17  ;;  %v457_v33 = vsel %vm306_vm1, %v452_v17, %v450_v28  ;;  %v2281_v28 = vld [vmem:[%s3491_s3 + $0x5e8] sm:$0xff] }
 0x18b   :  { %v467_v13 = vmax.f32 %v453_v34, %v462_v40  ;;  %v468_v46 = vmax.f32 %v457_v33, %v466_v18  ;;  %v2228_v18 = vld [vmem:[%s3491_s3 + $0x578] sm:$0xff]  ;;  %3649 = vst [vmem:[#allocation25_spill] sm:$0xff] %v2281_v28  ;;  %v2288_v33 = vld [vmem:[%s3491_s3 + $0x468] sm:$0xff]  ;;  %v2300_v40 = vld [vmem:[%s3491_s3 + $0x560] sm:$0xff] }
 0x18c   :  { %3650 = vst [vmem:[#allocation26_spill] sm:$0xff] %v2288_v33  ;;  %v2293_v34 = vld [vmem:[%s3491_s3 + $0x4e8] sm:$0xff] }
 0x18d   :  { %v469_v10 = vmax.f32 %v447_v26, %v467_v13  ;;  %v470_v9 = vmax.f32 %v448_v25, %v468_v46  ;;  %v2247_v13 = vld [vmem:[%s3491_s3 + $0x4f8] sm:$0xff]  ;;  %v2264_v25 = vld [vmem:[%s3491_s3 + $0x470] sm:$0xff]  ;;  %3651 = vst [vmem:[#allocation27_spill] sm:$0xff] %v2293_v34 }
 0x18e   :  { %v2269_v26 = vld [vmem:[%s3491_s3 + $0x4f0] sm:$0xff]  ;;  %3652 = vst [vmem:[#allocation28_spill] sm:$0xff] %v2300_v40 }
 0x191   :  { %v2217_v20 = vpop.permute.xlu0 %473 }
 0x192   :  { %v476_v23 = vadd.f32 %v2217_v20, %v469_v10  ;;  %v477_v39 = vadd.f32 %v2217_v20, %v470_v9  ;;  %v2242_v10 = vld [vmem:[%s3491_s3 + $0x478] sm:$0xff] }
 0x194   :  { %v2221_v19 = vmax.f32 %v476_v23, 0.0  ;;  %v2223_v17 = vmax.f32 %v477_v39, 0.0  ;;  %v2316_v39 = vld [vmem:[%s3491_s3 + $0x460] sm:$0xff] }
 0x195   :  { %3654 = vst [vmem:[#allocation30_spill] sm:$0xff] %v2316_v39 }
 0x196   :  { %542 = vmatmul.f32.vlgmr.msrb.gmra.mxu0 %v2221_v19  ;;  %562 = vmatmul.f32.vlgmr.msrb.gmra.mxu1 %v2223_v17  ;;  %v482_v44 = vrot.slane %v2221_v19, 1  ;;  %v483_v9 = vrot.slane %v2223_v17, 1  ;;  %v611_v46 = vrot.slane %v2221_v19, 3  ;;  %v612_v23 = vrot.slane %v2223_v17, 3 }
 0x197   :  { %705 = vmatpush.msrb.mxu0 %v2228_v18  ;;  %725 = vmatpush.msrb.mxu1 %v2233_v43 }
 0x198   :  { %502 = vmatmul.f32.vlgmr.msra.gmra.mxu2 %v482_v44  ;;  %522 = vmatmul.f32.vlgmr.msra.gmra.mxu3 %v483_v9  ;;  %v2321_v44 = vld [vmem:[%s3491_s3 + $0x4e0] sm:$0xff]  ;;  %v2328_v9 = vld [vmem:[%s3491_s3 + $0x558] sm:$0xff] }
 0x199   :  { %660 = vmatpush.msra.mxu2 %v2242_v10  ;;  %680 = vmatpush.msra.mxu3 %v2247_v13  ;;  %3655 = vst [vmem:[#allocation31_spill] sm:$0xff] %v2321_v44 }
 0x19a   :  { %706 = vmatpush.msrb.mxu0 %v2254_v14  ;;  %726 = vmatpush.msrb.mxu1 %v2259_v24  ;;  %3656 = vst [vmem:[#allocation32_spill] sm:$0xff] %v2328_v9 }
 0x19b   :  { %661 = vmatpush.msra.mxu2 %v2264_v25  ;;  %681 = vmatpush.msra.mxu3 %v2269_v26 }
 0x19c   :  { %707 = vmatpush.msrb.mxu0 %v2276_v27  ;;  %727 = vmatpush.msrb.mxu1 %v2281_v28  ;;  %v2347_v28 = vld [vmem:[%s3491_s3 + $0x4d8] sm:$0xff] }
 0x19d   :  { %662 = vmatpush.msra.mxu2 %v2288_v33  ;;  %682 = vmatpush.msra.mxu3 %v2293_v34  ;;  %v2333_v34 = vld [vmem:[%s3491_s3 + $0x5d8] sm:$0xff]  ;;  %3659 = vst [vmem:[#allocation35_spill] sm:$0xff] %v2347_v28 }
 0x19e   :  { %708 = vmatpush.msrb.mxu0 %v2300_v40  ;;  %728 = vmatpush.msrb.mxu1 %v2305_v45  ;;  %3657 = vst [vmem:[#allocation33_spill] sm:$0xff] %v2333_v34  ;;  %v566_v40 = vrot.slane %v2221_v19, 2  ;;  %v567_v45 = vrot.slane %v2223_v17, 2  ;;  %v2342_v33 = vld [vmem:[%s3491_s3 + $0x458] sm:$0xff] }
 0x19f   :  { %631 = vmatmul.f32.vlgmr.msra.gmra.mxu0 %v611_v46  ;;  %651 = vmatmul.f32.vlgmr.msra.gmra.mxu1 %v612_v23  ;;  %3658 = vst [vmem:[#allocation34_spill] sm:$0xff] %v2342_v33  ;;  %v2354_v46 = vld [vmem:[%s3491_s3 + $0x550] sm:$0xff] }
 0x1a0   :  { %663 = vmatpush.msra.mxu2 %v2316_v39  ;;  %683 = vmatpush.msra.mxu3 %v2321_v44  ;;  %3660 = vst [vmem:[#allocation36_spill] sm:$0xff] %v2354_v46  ;;  %v2359_v23 = vld [vmem:[%s3491_s3 + $0x5d0] sm:$0xff]  ;;  %v2613_v39 = vld [vmem:[%s3491_s3 + $0x7f8] sm:$0xff] }
 0x1a1   :  { %709 = vmatpush.msrb.mxu0 %v2328_v9  ;;  %729 = vmatpush.msrb.mxu1 %v2333_v34  ;;  %3661 = vst [vmem:[#allocation37_spill] sm:$0xff] %v2359_v23  ;;  %v2364_v44 = vld [vmem:[%s3491_s3 + $0x450] sm:$0xff]  ;;  %v2376_v9 = vld [vmem:[%s3491_s3 + $0x548] sm:$0xff] }
 0x1a2   :  { %586 = vmatmul.f32.vlgmr.msrb.gmra.mxu2 %v566_v40  ;;  %606 = vmatmul.f32.vlgmr.msrb.gmra.mxu3 %v567_v45  ;;  %3662 = vst [vmem:[#allocation38_spill] sm:$0xff] %v2364_v44  ;;  %v2369_v34 = vld [vmem:[%s3491_s3 + $0x4d0] sm:$0xff]  ;;  %v2381_v40 = vld [vmem:[%s3491_s3 + $0x5c8] sm:$0xff] }
 0x1a3   :  { %3663 = vst [vmem:[#allocation39_spill] sm:$0xff] %v2369_v34  ;;  %664 = vmatpush.msra.mxu2 %v2342_v33  ;;  %684 = vmatpush.msra.mxu3 %v2347_v28  ;;  %v2388_v45 = vld [vmem:[%s3491_s3 + $0x448] sm:$0xff]  ;;  %v2608_v33 = vld [vmem:[%s3491_s3 + $0x778] sm:$0xff] }
 0x1a4   :  { %3664 = vst [vmem:[#allocation40_spill] sm:$0xff] %v2376_v9  ;;  %710 = vmatpush.msrb.mxu0 %v2354_v46  ;;  %730 = vmatpush.msrb.mxu1 %v2359_v23  ;;  %v2393_v28 = vld [vmem:[%s3491_s3 + $0x4c8] sm:$0xff]  ;;  %v2400_v46 = vld [vmem:[%s3491_s3 + $0x540] sm:$0xff] }
 0x1a5   :  { %3665 = vst [vmem:[#allocation41_spill] sm:$0xff] %v2381_v40  ;;  %665 = vmatpush.msra.mxu2 %v2364_v44  ;;  %685 = vmatpush.msra.mxu3 %v2369_v34  ;;  %v2405_v23 = vld [vmem:[%s3491_s3 + $0x5c0] sm:$0xff] }
 0x1a6   :  { %3666 = vst [vmem:[#allocation42_spill] sm:$0xff] %v2388_v45  ;;  %711 = vmatpush.msrb.mxu0 %v2376_v9  ;;  %731 = vmatpush.msrb.mxu1 %v2381_v40  ;;  %v2412_v44 = vld [vmem:[%s3491_s3 + $0x440] sm:$0xff]  ;;  %v2424_v9 = vld [vmem:[%s3491_s3 + $0x538] sm:$0xff] }
 0x1a7   :  { %3667 = vst [vmem:[#allocation43_spill] sm:$0xff] %v2393_v28  ;;  %v2417_v34 = vld [vmem:[%s3491_s3 + $0x4c0] sm:$0xff]  ;;  %666 = vmatpush.msra.mxu2 %v2388_v45  ;;  %686 = vmatpush.msra.mxu3 %v2393_v28  ;;  %v2429_v40 = vld [vmem:[%s3491_s3 + $0x5b8] sm:$0xff] }
 0x1a8   :  { %3668 = vst [vmem:[#allocation44_spill] sm:$0xff] %v2400_v46  ;;  %712 = vmatpush.msrb.mxu0 %v2400_v46  ;;  %732 = vmatpush.msrb.mxu1 %v2405_v23  ;;  %v2436_v45 = vld [vmem:[%s3491_s3 + $0x438] sm:$0xff]  ;;  %v2448_v46 = vld [vmem:[%s3491_s3 + $0x530] sm:$0xff] }
 0x1a9   :  { %3669 = vst [vmem:[#allocation45_spill] sm:$0xff] %v2405_v23  ;;  %v2441_v28 = vld [vmem:[%s3491_s3 + $0x4b8] sm:$0xff]  ;;  %667 = vmatpush.msra.mxu2 %v2412_v44  ;;  %687 = vmatpush.msra.mxu3 %v2417_v34  ;;  %v2453_v23 = vld [vmem:[%s3491_s3 + $0x5b0] sm:$0xff] }
 0x1aa   :  { %3670 = vst [vmem:[#allocation46_spill] sm:$0xff] %v2412_v44  ;;  %713 = vmatpush.msrb.mxu0 %v2424_v9  ;;  %733 = vmatpush.msrb.mxu1 %v2429_v40  ;;  %v2460_v44 = vld [vmem:[%s3491_s3 + $0x430] sm:$0xff] }
 0x1ab   :  { %3671 = vst [vmem:[#allocation47_spill] sm:$0xff] %v2417_v34  ;;  %v2465_v34 = vld [vmem:[%s3491_s3 + $0x4b0] sm:$0xff]  ;;  %668 = vmatpush.msra.mxu2 %v2436_v45  ;;  %688 = vmatpush.msra.mxu3 %v2441_v28 }
 0x1ac   :  { %3672 = vst [vmem:[#allocation48_spill] sm:$0xff] %v2424_v9  ;;  %v2472_v9 = vld [vmem:[%s3491_s3 + $0x528] sm:$0xff]  ;;  %714 = vmatpush.msrb.mxu0 %v2448_v46  ;;  %734 = vmatpush.msrb.mxu1 %v2453_v23 }
 0x1ad   :  { %3673 = vst [vmem:[#allocation49_spill] sm:$0xff] %v2429_v40  ;;  %v2477_v40 = vld [vmem:[%s3491_s3 + $0x5a8] sm:$0xff]  ;;  %669 = vmatpush.msra.mxu2 %v2460_v44  ;;  %689 = vmatpush.msra.mxu3 %v2465_v34 }
 0x1ae   :  { %3674 = vst [vmem:[#allocation50_spill] sm:$0xff] %v2436_v45  ;;  %v2484_v45 = vld [vmem:[%s3491_s3 + $0x428] sm:$0xff]  ;;  %715 = vmatpush.msrb.mxu0 %v2472_v9  ;;  %735 = vmatpush.msrb.mxu1 %v2477_v40 }
 0x1af   :  { %3675 = vst [vmem:[#allocation51_spill] sm:$0xff] %v2441_v28  ;;  %v2489_v28 = vld [vmem:[%s3491_s3 + $0x4a8] sm:$0xff]  ;;  %670 = vmatpush.msra.mxu2 %v2484_v45 }
 0x1b0   :  { %3676 = vst [vmem:[#allocation52_spill] sm:$0xff] %v2448_v46  ;;  %v2496_v46 = vld [vmem:[%s3491_s3 + $0x520] sm:$0xff]  ;;  %690 = vmatpush.msra.mxu3 %v2489_v28 }
 0x1b1   :  { %3677 = vst [vmem:[#allocation53_spill] sm:$0xff] %v2453_v23  ;;  %v2501_v23 = vld [vmem:[%s3491_s3 + $0x5a0] sm:$0xff]  ;;  %716 = vmatpush.msrb.mxu0 %v2496_v46 }
 0x1b2   :  { %3678 = vst [vmem:[#allocation54_spill] sm:$0xff] %v2460_v44  ;;  %v2508_v44 = vld [vmem:[%s3491_s3 + $0x420] sm:$0xff]  ;;  %736 = vmatpush.msrb.mxu1 %v2501_v23 }
 0x1b3   :  { %3679 = vst [vmem:[#allocation55_spill] sm:$0xff] %v2465_v34  ;;  %v2513_v34 = vld [vmem:[%s3491_s3 + $0x4a0] sm:$0xff]  ;;  %671 = vmatpush.msra.mxu2 %v2508_v44 }
 0x1b4   :  { %3680 = vst [vmem:[#allocation56_spill] sm:$0xff] %v2472_v9  ;;  %v2520_v9 = vld [vmem:[%s3491_s3 + $0x518] sm:$0xff]  ;;  %691 = vmatpush.msra.mxu3 %v2513_v34 }
 0x1b5   :  { %3681 = vst [vmem:[#allocation57_spill] sm:$0xff] %v2477_v40  ;;  %v2525_v40 = vld [vmem:[%s3491_s3 + $0x598] sm:$0xff]  ;;  %717 = vmatpush.msrb.mxu0 %v2520_v9 }
 0x1b6   :  { %3682 = vst [vmem:[#allocation58_spill] sm:$0xff] %v2484_v45  ;;  %v2532_v45 = vld [vmem:[%s3491_s3 + $0x418] sm:$0xff]  ;;  %737 = vmatpush.msrb.mxu1 %v2525_v40 }
 0x1b7   :  { %3683 = vst [vmem:[#allocation59_spill] sm:$0xff] %v2489_v28  ;;  %v2537_v28 = vld [vmem:[%s3491_s3 + $0x498] sm:$0xff]  ;;  %672 = vmatpush.msra.mxu2 %v2532_v45 }
 0x1b8   :  { %3684 = vst [vmem:[#allocation60_spill] sm:$0xff] %v2496_v46  ;;  %v2544_v46 = vld [vmem:[%s3491_s3 + $0x510] sm:$0xff]  ;;  %692 = vmatpush.msra.mxu3 %v2537_v28 }
 0x1b9   :  { %3685 = vst [vmem:[#allocation61_spill] sm:$0xff] %v2501_v23  ;;  %v2549_v23 = vld [vmem:[%s3491_s3 + $0x590] sm:$0xff]  ;;  %718 = vmatpush.msrb.mxu0 %v2544_v46 }
 0x1ba   :  { %3686 = vst [vmem:[#allocation62_spill] sm:$0xff] %v2508_v44  ;;  %v2556_v44 = vld [vmem:[%s3491_s3 + $0x410] sm:$0xff]  ;;  %738 = vmatpush.msrb.mxu1 %v2549_v23 }
 0x1bb   :  { %3687 = vst [vmem:[#allocation63_spill] sm:$0xff] %v2513_v34  ;;  %v2561_v34 = vld [vmem:[%s3491_s3 + $0x490] sm:$0xff]  ;;  %673 = vmatpush.msra.mxu2 %v2556_v44 }
 0x1bc   :  { %3688 = vst [vmem:[#allocation64_spill] sm:$0xff] %v2520_v9  ;;  %v2568_v9 = vld [vmem:[%s3491_s3 + $0x508] sm:$0xff]  ;;  %693 = vmatpush.msra.mxu3 %v2561_v34 }
 0x1bd   :  { %3689 = vst [vmem:[#allocation65_spill] sm:$0xff] %v2525_v40  ;;  %v2573_v40 = vld [vmem:[%s3491_s3 + $0x588] sm:$0xff]  ;;  %719 = vmatpush.msrb.mxu0 %v2568_v9 }
 0x1be   :  { %3690 = vst [vmem:[#allocation66_spill] sm:$0xff] %v2532_v45  ;;  %v2580_v45 = vld [vmem:[%s3491_s3 + $0x408] sm:$0xff]  ;;  %739 = vmatpush.msrb.mxu1 %v2573_v40 }
 0x1bf   :  { %3691 = vst [vmem:[#allocation67_spill] sm:$0xff] %v2537_v28  ;;  %v2585_v28 = vld [vmem:[%s3491_s3 + $0x488] sm:$0xff]  ;;  %674 = vmatpush.msra.mxu2 %v2580_v45 }
 0x1c0   :  { %3692 = vst [vmem:[#allocation68_spill] sm:$0xff] %v2544_v46  ;;  %v2592_v46 = vld [vmem:[%s3491_s3 + $0x500] sm:$0xff]  ;;  %694 = vmatpush.msra.mxu3 %v2585_v28 }
 0x1c1   :  { %3693 = vst [vmem:[#allocation69_spill] sm:$0xff] %v2549_v23  ;;  %v2597_v23 = vld [vmem:[%s3491_s3 + $0x580] sm:$0xff]  ;;  %720 = vmatpush.msrb.mxu0 %v2592_v46 }
 0x1c2   :  { %3694 = vst [vmem:[#allocation70_spill] sm:$0xff] %v2556_v44  ;;  %v702_v44 = vrot.slane %v2223_v17, 5  ;;  %740 = vmatpush.msrb.mxu1 %v2597_v23 }
 0x1c3   :  { %3695 = vst [vmem:[#allocation71_spill] sm:$0xff] %v2561_v34  ;;  %v701_v34 = vrot.slane %v2221_v19, 5  ;;  %795 = vmatpush.msra.mxu0 %v2608_v33 }
 0x1c4   :  { %3696 = vst [vmem:[#allocation72_spill] sm:$0xff] %v2568_v9  ;;  %741 = vmatmul.f32.vlgmr.msrb.gmra.mxu1 %v702_v44  ;;  %v2639_v9 = vld [vmem:[%s3491_s3 + $0x6f8] sm:$0xff]  ;;  %v2651_v44 = vld [vmem:[%s3491_s3 + $0x7f0] sm:$0xff] }
 0x1c5   :  { %3697 = vst [vmem:[#allocation73_spill] sm:$0xff] %v2573_v40  ;;  %721 = vmatmul.f32.vlgmr.msrb.gmra.mxu0 %v701_v34  ;;  %815 = vmatpush.msra.mxu1 %v2613_v39  ;;  %v2634_v40 = vld [vmem:[%s3491_s3 + $0x678] sm:$0xff]  ;;  %v2646_v34 = vld [vmem:[%s3491_s3 + $0x770] sm:$0xff] }
 0x1c6   :  { %3698 = vst [vmem:[#allocation74_spill] sm:$0xff] %v2580_v45  ;;  %v2625_v45 = vld [vmem:[%s3491_s3 + $0x480] sm:$0xff]  ;;  %796 = vmatpush.msra.mxu0 %v2646_v34 }
 0x1c7   :  { %3699 = vst [vmem:[#allocation75_spill] sm:$0xff] %v2585_v28  ;;  %v2620_v28 = vld [vmem:[%s3491_s3 + $0x400] sm:$0xff]  ;;  %695 = vmatpush.msra.mxu3 %v2625_v45  ;;  %816 = vmatpush.msra.mxu1 %v2651_v44 }
 0x1c8   :  { %3700 = vst [vmem:[#allocation76_spill] sm:$0xff] %v2592_v46  ;;  %v656_v46 = vrot.slane %v2221_v19, 4  ;;  %675 = vmatpush.msra.mxu2 %v2620_v28 }
 0x1c9   :  { %3701 = vst [vmem:[#allocation77_spill] sm:$0xff] %v2597_v23  ;;  %v657_v23 = vrot.slane %v2223_v17, 4  ;;  %770 = vmatpush.msrb.mxu3 %v2639_v9 }
 0x1ca   :  { %3702 = vst [vmem:[#allocation78_spill] sm:$0xff] %v2608_v33  ;;  %676 = vmatmul.f32.vlgmr.msra.gmra.mxu2 %v656_v46  ;;  %v2673_v46 = vld [vmem:[%s3491_s3 + $0x7e8] sm:$0xff]  ;;  %v3001_v33 = vld [vmem:[%s3491_s3 + $0x680] sm:$0xff] }
 0x1cb   :  { %3703 = vst [vmem:[#allocation79_spill] sm:$0xff] %v2613_v39  ;;  %696 = vmatmul.f32.vlgmr.msra.gmra.mxu3 %v657_v23  ;;  %v2656_v39 = vld [vmem:[%s3491_s3 + $0x670] sm:$0xff]  ;;  %750 = vmatpush.msrb.mxu2 %v2634_v40  ;;  %v2680_v23 = vld [vmem:[%s3491_s3 + $0x668] sm:$0xff] }
 0x1cc   :  { %3704 = vst [vmem:[#allocation80_spill] sm:$0xff] %v2620_v28  ;;  %v2668_v28 = vld [vmem:[%s3491_s3 + $0x768] sm:$0xff]  ;;  %817 = vmatpush.msra.mxu1 %v2673_v46 }
 0x1cd   :  { %3705 = vst [vmem:[#allocation81_spill] sm:$0xff] %v2625_v45  ;;  %v2661_v45 = vld [vmem:[%s3491_s3 + $0x6f0] sm:$0xff]  ;;  %751 = vmatpush.msrb.mxu2 %v2656_v39  ;;  %797 = vmatpush.msra.mxu0 %v2668_v28 }
 0x1ce   :  { %3706 = vst [vmem:[#allocation82_spill] sm:$0xff] %v2634_v40  ;;  %771 = vmatpush.msrb.mxu3 %v2661_v45  ;;  %v2996_v40 = vld [vmem:[%s3491_s3 + $0x600] sm:$0xff] }
 0x1cf   :  { %3707 = vst [vmem:[#allocation83_spill] sm:$0xff] %v2639_v9  ;;  %v2685_v9 = vld [vmem:[%s3491_s3 + $0x6e8] sm:$0xff]  ;;  %752 = vmatpush.msrb.mxu2 %v2680_v23 }
 0x1d0   :  { %3708 = vst [vmem:[#allocation84_spill] sm:$0xff] %v2646_v34  ;;  %v2692_v34 = vld [vmem:[%s3491_s3 + $0x760] sm:$0xff]  ;;  %772 = vmatpush.msrb.mxu3 %v2685_v9 }
 0x1d1   :  { %3709 = vst [vmem:[#allocation85_spill] sm:$0xff] %v2651_v44  ;;  %v2697_v44 = vld [vmem:[%s3491_s3 + $0x7e0] sm:$0xff]  ;;  %798 = vmatpush.msra.mxu0 %v2692_v34 }
 0x1d2   :  { %3710 = vst [vmem:[#allocation86_spill] sm:$0xff] %v2656_v39  ;;  %v2704_v39 = vld [vmem:[%s3491_s3 + $0x660] sm:$0xff]  ;;  %818 = vmatpush.msra.mxu1 %v2697_v44 }
 0x1d3   :  { %3711 = vst [vmem:[#allocation87_spill] sm:$0xff] %v2661_v45  ;;  %v2709_v45 = vld [vmem:[%s3491_s3 + $0x6e0] sm:$0xff]  ;;  %753 = vmatpush.msrb.mxu2 %v2704_v39 }
 0x1d4   :  { %3712 = vst [vmem:[#allocation88_spill] sm:$0xff] %v2668_v28  ;;  %v2716_v28 = vld [vmem:[%s3491_s3 + $0x758] sm:$0xff]  ;;  %773 = vmatpush.msrb.mxu3 %v2709_v45 }
 0x1d5   :  { %3713 = vst [vmem:[#allocation89_spill] sm:$0xff] %v2673_v46  ;;  %v2721_v46 = vld [vmem:[%s3491_s3 + $0x7d8] sm:$0xff]  ;;  %799 = vmatpush.msra.mxu0 %v2716_v28 }
 0x1d6   :  { %3714 = vst [vmem:[#allocation90_spill] sm:$0xff] %v2680_v23  ;;  %v2728_v23 = vld [vmem:[%s3491_s3 + $0x658] sm:$0xff]  ;;  %819 = vmatpush.msra.mxu1 %v2721_v46 }
 0x1d7   :  { %3715 = vst [vmem:[#allocation91_spill] sm:$0xff] %v2685_v9  ;;  %v2733_v9 = vld [vmem:[%s3491_s3 + $0x6d8] sm:$0xff]  ;;  %754 = vmatpush.msrb.mxu2 %v2728_v23 }
 0x1d8   :  { %3716 = vst [vmem:[#allocation92_spill] sm:$0xff] %v2692_v34  ;;  %v2740_v34 = vld [vmem:[%s3491_s3 + $0x750] sm:$0xff]  ;;  %774 = vmatpush.msrb.mxu3 %v2733_v9 }
 0x1d9   :  { %3717 = vst [vmem:[#allocation93_spill] sm:$0xff] %v2697_v44  ;;  %v2745_v44 = vld [vmem:[%s3491_s3 + $0x7d0] sm:$0xff]  ;;  %800 = vmatpush.msra.mxu0 %v2740_v34 }
 0x1da   :  { %3718 = vst [vmem:[#allocation94_spill] sm:$0xff] %v2704_v39  ;;  %v2752_v39 = vld [vmem:[%s3491_s3 + $0x650] sm:$0xff]  ;;  %820 = vmatpush.msra.mxu1 %v2745_v44 }
 0x1db   :  { %3719 = vst [vmem:[#allocation95_spill] sm:$0xff] %v2709_v45  ;;  %v2757_v45 = vld [vmem:[%s3491_s3 + $0x6d0] sm:$0xff]  ;;  %755 = vmatpush.msrb.mxu2 %v2752_v39 }
 0x1dc   :  { %3720 = vst [vmem:[#allocation96_spill] sm:$0xff] %v2716_v28  ;;  %v2764_v28 = vld [vmem:[%s3491_s3 + $0x748] sm:$0xff]  ;;  %775 = vmatpush.msrb.mxu3 %v2757_v45 }
 0x1dd   :  { %3721 = vst [vmem:[#allocation97_spill] sm:$0xff] %v2721_v46  ;;  %v2769_v46 = vld [vmem:[%s3491_s3 + $0x7c8] sm:$0xff]  ;;  %801 = vmatpush.msra.mxu0 %v2764_v28 }
 0x1de   :  { %3722 = vst [vmem:[#allocation98_spill] sm:$0xff] %v2728_v23  ;;  %v2776_v23 = vld [vmem:[%s3491_s3 + $0x648] sm:$0xff]  ;;  %821 = vmatpush.msra.mxu1 %v2769_v46 }
 0x1df   :  { %3723 = vst [vmem:[#allocation99_spill] sm:$0xff] %v2733_v9  ;;  %v2781_v9 = vld [vmem:[%s3491_s3 + $0x6c8] sm:$0xff]  ;;  %756 = vmatpush.msrb.mxu2 %v2776_v23 }
 0x1e0   :  { %3724 = vst [vmem:[#allocation100_spill] sm:$0xff] %v2740_v34  ;;  %v2788_v34 = vld [vmem:[%s3491_s3 + $0x740] sm:$0xff]  ;;  %776 = vmatpush.msrb.mxu3 %v2781_v9 }
 0x1e1   :  { %3725 = vst [vmem:[#allocation101_spill] sm:$0xff] %v2745_v44  ;;  %v2793_v44 = vld [vmem:[%s3491_s3 + $0x7c0] sm:$0xff]  ;;  %802 = vmatpush.msra.mxu0 %v2788_v34 }
 0x1e2   :  { %3726 = vst [vmem:[#allocation102_spill] sm:$0xff] %v2752_v39  ;;  %v2800_v39 = vld [vmem:[%s3491_s3 + $0x640] sm:$0xff]  ;;  %822 = vmatpush.msra.mxu1 %v2793_v44 }
 0x1e3   :  { %3727 = vst [vmem:[#allocation103_spill] sm:$0xff] %v2757_v45  ;;  %v2805_v45 = vld [vmem:[%s3491_s3 + $0x6c0] sm:$0xff]  ;;  %757 = vmatpush.msrb.mxu2 %v2800_v39 }
 0x1e4   :  { %3728 = vst [vmem:[#allocation104_spill] sm:$0xff] %v2764_v28  ;;  %v2812_v28 = vld [vmem:[%s3491_s3 + $0x738] sm:$0xff]  ;;  %777 = vmatpush.msrb.mxu3 %v2805_v45 }
 0x1e5   :  { %3729 = vst [vmem:[#allocation105_spill] sm:$0xff] %v2769_v46  ;;  %v2817_v46 = vld [vmem:[%s3491_s3 + $0x7b8] sm:$0xff]  ;;  %803 = vmatpush.msra.mxu0 %v2812_v28 }
 0x1e6   :  { %3730 = vst [vmem:[#allocation106_spill] sm:$0xff] %v2776_v23  ;;  %v2824_v23 = vld [vmem:[%s3491_s3 + $0x638] sm:$0xff]  ;;  %823 = vmatpush.msra.mxu1 %v2817_v46 }
 0x1e7   :  { %3731 = vst [vmem:[#allocation107_spill] sm:$0xff] %v2781_v9  ;;  %v2829_v9 = vld [vmem:[%s3491_s3 + $0x6b8] sm:$0xff]  ;;  %758 = vmatpush.msrb.mxu2 %v2824_v23 }
 0x1e8   :  { %3732 = vst [vmem:[#allocation108_spill] sm:$0xff] %v2788_v34  ;;  %v2836_v34 = vld [vmem:[%s3491_s3 + $0x730] sm:$0xff]  ;;  %778 = vmatpush.msrb.mxu3 %v2829_v9 }
 0x1e9   :  { %3733 = vst [vmem:[#allocation109_spill] sm:$0xff] %v2793_v44  ;;  %v2841_v44 = vld [vmem:[%s3491_s3 + $0x7b0] sm:$0xff]  ;;  %804 = vmatpush.msra.mxu0 %v2836_v34 }
 0x1ea   :  { %3734 = vst [vmem:[#allocation110_spill] sm:$0xff] %v2800_v39  ;;  %v2848_v39 = vld [vmem:[%s3491_s3 + $0x630] sm:$0xff]  ;;  %824 = vmatpush.msra.mxu1 %v2841_v44 }
 0x1eb   :  { %3735 = vst [vmem:[#allocation111_spill] sm:$0xff] %v2805_v45  ;;  %v2853_v45 = vld [vmem:[%s3491_s3 + $0x6b0] sm:$0xff]  ;;  %759 = vmatpush.msrb.mxu2 %v2848_v39 }
 0x1ec   :  { %3736 = vst [vmem:[#allocation112_spill] sm:$0xff] %v2812_v28  ;;  %v2860_v28 = vld [vmem:[%s3491_s3 + $0x728] sm:$0xff]  ;;  %779 = vmatpush.msrb.mxu3 %v2853_v45 }
 0x1ed   :  { %3737 = vst [vmem:[#allocation113_spill] sm:$0xff] %v2817_v46  ;;  %v2865_v46 = vld [vmem:[%s3491_s3 + $0x7a8] sm:$0xff]  ;;  %805 = vmatpush.msra.mxu0 %v2860_v28 }
 0x1ee   :  { %3738 = vst [vmem:[#allocation114_spill] sm:$0xff] %v2824_v23  ;;  %v2872_v23 = vld [vmem:[%s3491_s3 + $0x628] sm:$0xff]  ;;  %825 = vmatpush.msra.mxu1 %v2865_v46 }
 0x1ef   :  { %3739 = vst [vmem:[#allocation115_spill] sm:$0xff] %v2829_v9  ;;  %v2877_v9 = vld [vmem:[%s3491_s3 + $0x6a8] sm:$0xff]  ;;  %760 = vmatpush.msrb.mxu2 %v2872_v23 }
 0x1f0   :  { %3740 = vst [vmem:[#allocation116_spill] sm:$0xff] %v2836_v34  ;;  %v2884_v34 = vld [vmem:[%s3491_s3 + $0x720] sm:$0xff]  ;;  %780 = vmatpush.msrb.mxu3 %v2877_v9 }
 0x1f1   :  { %3741 = vst [vmem:[#allocation117_spill] sm:$0xff] %v2841_v44  ;;  %v2889_v44 = vld [vmem:[%s3491_s3 + $0x7a0] sm:$0xff]  ;;  %806 = vmatpush.msra.mxu0 %v2884_v34 }
 0x1f2   :  { %3742 = vst [vmem:[#allocation118_spill] sm:$0xff] %v2848_v39  ;;  %v2896_v39 = vld [vmem:[%s3491_s3 + $0x620] sm:$0xff]  ;;  %826 = vmatpush.msra.mxu1 %v2889_v44 }
 0x1f3   :  { %3743 = vst [vmem:[#allocation119_spill] sm:$0xff] %v2853_v45  ;;  %v2901_v45 = vld [vmem:[%s3491_s3 + $0x6a0] sm:$0xff]  ;;  %761 = vmatpush.msrb.mxu2 %v2896_v39 }
 0x1f4   :  { %3744 = vst [vmem:[#allocation120_spill] sm:$0xff] %v2860_v28  ;;  %v2908_v28 = vld [vmem:[%s3491_s3 + $0x718] sm:$0xff]  ;;  %781 = vmatpush.msrb.mxu3 %v2901_v45 }
 0x1f5   :  { %3745 = vst [vmem:[#allocation121_spill] sm:$0xff] %v2865_v46  ;;  %v2913_v46 = vld [vmem:[%s3491_s3 + $0x798] sm:$0xff]  ;;  %807 = vmatpush.msra.mxu0 %v2908_v28 }
 0x1f6   :  { %3746 = vst [vmem:[#allocation122_spill] sm:$0xff] %v2872_v23  ;;  %v2920_v23 = vld [vmem:[%s3491_s3 + $0x618] sm:$0xff]  ;;  %827 = vmatpush.msra.mxu1 %v2913_v46 }
 0x1f7   :  { %3747 = vst [vmem:[#allocation123_spill] sm:$0xff] %v2877_v9  ;;  %v2925_v9 = vld [vmem:[%s3491_s3 + $0x698] sm:$0xff]  ;;  %762 = vmatpush.msrb.mxu2 %v2920_v23 }
 0x1f8   :  { %3748 = vst [vmem:[#allocation124_spill] sm:$0xff] %v2884_v34  ;;  %v2932_v34 = vld [vmem:[%s3491_s3 + $0x710] sm:$0xff]  ;;  %782 = vmatpush.msrb.mxu3 %v2925_v9 }
 0x1f9   :  { %3749 = vst [vmem:[#allocation125_spill] sm:$0xff] %v2889_v44  ;;  %v2937_v44 = vld [vmem:[%s3491_s3 + $0x790] sm:$0xff]  ;;  %808 = vmatpush.msra.mxu0 %v2932_v34 }
 0x1fa   :  { %3750 = vst [vmem:[#allocation126_spill] sm:$0xff] %v2896_v39  ;;  %v2944_v39 = vld [vmem:[%s3491_s3 + $0x610] sm:$0xff]  ;;  %828 = vmatpush.msra.mxu1 %v2937_v44 }
 0x1fb   :  { %3751 = vst [vmem:[#allocation127_spill] sm:$0xff] %v2901_v45  ;;  %v2949_v45 = vld [vmem:[%s3491_s3 + $0x690] sm:$0xff]  ;;  %763 = vmatpush.msrb.mxu2 %v2944_v39 }
 0x1fc   :  { %3752 = vst [vmem:[#allocation128_spill] sm:$0xff] %v2908_v28  ;;  %v2956_v28 = vld [vmem:[%s3491_s3 + $0x708] sm:$0xff]  ;;  %783 = vmatpush.msrb.mxu3 %v2949_v45 }
 0x1fd   :  { %3753 = vst [vmem:[#allocation129_spill] sm:$0xff] %v2913_v46  ;;  %v2961_v46 = vld [vmem:[%s3491_s3 + $0x788] sm:$0xff]  ;;  %809 = vmatpush.msra.mxu0 %v2956_v28 }
 0x1fe   :  { %3754 = vst [vmem:[#allocation130_spill] sm:$0xff] %v2920_v23  ;;  %v2968_v23 = vld [vmem:[%s3491_s3 + $0x608] sm:$0xff]  ;;  %829 = vmatpush.msra.mxu1 %v2961_v46 }
 0x1ff   :  { %3755 = vst [vmem:[#allocation131_spill] sm:$0xff] %v2925_v9  ;;  %v2973_v9 = vld [vmem:[%s3491_s3 + $0x688] sm:$0xff]  ;;  %764 = vmatpush.msrb.mxu2 %v2968_v23 }
 0x200   :  { %3756 = vst [vmem:[#allocation132_spill] sm:$0xff] %v2932_v34  ;;  %v2980_v34 = vld [vmem:[%s3491_s3 + $0x700] sm:$0xff]  ;;  %784 = vmatpush.msrb.mxu3 %v2973_v9 }
 0x201   :  { %3757 = vst [vmem:[#allocation133_spill] sm:$0xff] %v2937_v44  ;;  %v2985_v44 = vld [vmem:[%s3491_s3 + $0x780] sm:$0xff]  ;;  %810 = vmatpush.msra.mxu0 %v2980_v34  ;;  %765 = vmatpush.msrb.mxu2 %v2996_v40 }
 0x202   :  { %3758 = vst [vmem:[#allocation134_spill] sm:$0xff] %v2944_v39  ;;  %v792_v39 = vrot.slane %v2223_v17, 7  ;;  %830 = vmatpush.msra.mxu1 %v2985_v44  ;;  %785 = vmatpush.msrb.mxu3 %v3001_v33 }
 0x203   :  { %3759 = vst [vmem:[#allocation135_spill] sm:$0xff] %v2949_v45  ;;  %v791_v45 = vrot.slane %v2221_v19, 7 }
 0x204   :  { %3760 = vst [vmem:[#allocation136_spill] sm:$0xff] %v2956_v28  ;;  %831 = vmatmul.f32.vlgmr.msra.gmra.mxu1 %v792_v39  ;;  %v860_v28 = vrot.slane %v1609_v37, 4  ;;  %v1421_v37 = vld [vmem:[%s3488_s0] sm:$0xff] }
 0x205   :  { %3761 = vst [vmem:[#allocation137_spill] sm:$0xff] %v2961_v46  ;;  %811 = vmatmul.f32.vlgmr.msra.gmra.mxu0 %v791_v45  ;;  %v859_v46 = vrot.slane %v1607_v36, 4  ;;  %v1420_v36 = vld [vmem:[%s3491_s3 + $0x1f8] sm:$0xff]  ;;  %v1426_v45 = vld [vmem:[%s3491_s3 + $0x1e8] sm:$0xff] }
 0x206   :  { %3762 = vst [vmem:[#allocation138_spill] sm:$0xff] %v2968_v23  ;;  %v747_v23 = vrot.slane %v2223_v17, 6  ;;  %1366 = vmatpush.msk.msra.mxu3 %vm378_vm3, %v860_v28  ;;  %978 = vmatpush.msrb.mxu1 %v1420_v36  ;;  %v840_v17 = vrot.slane %v1421_v37, 4  ;;  %v1422_v28 = vld [vmem:[%s3488_s0 + $0x8] sm:$0xff]  ;;  %v1434_v36 = vld [vmem:[%s3491_s3 + $0x70] sm:$0xff] }
 0x207   :  { %3763 = vst [vmem:[#allocation139_spill] sm:$0xff] %v2973_v9  ;;  %v746_v9 = vrot.slane %v2221_v19, 6  ;;  %1364 = vmatpush.msk.msra.mxu2 %vm378_vm3, %v859_v46  ;;  %v1419_v19 = vld [vmem:[%s3491_s3 + $0x178] sm:$0xff]  ;;  %v841_v39 = vrot.slane %v1422_v28, 4  ;;  %v1435_v37 = vld [vmem:[%s3491_s3 + $0xf0] sm:$0xff] }
 0x208   :  { %786 = vmatmul.f32.vlgmr.msrb.gmra.mxu3 %v747_v23  ;;  %958 = vmatpush.msrb.mxu0 %v1419_v19  ;;  %v861_v46 = vsel %vm378_vm3, %v840_v17, %v1620_v52  ;;  %v1428_v23 = vld [vmem:[%s3491_s3 + $0x1e0] sm:$0xff]  ;;  %v1431_v52 = vld [vmem:[%s3491_s3 + $0xf8] sm:$0xff]  ;;  %v1436_v17 = vld [vmem:[%s3491_s3 + $0x150] sm:$0xff] }
 0x209   :  { %766 = vmatmul.f32.vlgmr.msrb.gmra.mxu2 %v746_v9  ;;  %905 = vmatpush.msra.mxu3 %v1605_v31  ;;  %v1423_v9 = vld [vmem:[%s3491_s3 + $0x170] sm:$0xff]  ;;  %v1425_v31 = vld [vmem:[%s3491_s3 + $0x168] sm:$0xff]  ;;  %v1433_v19 = vld [vmem:[%s3491_s3 + $0x1d8] sm:$0xff] }
 0x20a   :  { %885 = vmatpush.msra.mxu2 %v1602_v30  ;;  %959 = vmatpush.msrb.mxu0 %v1423_v9  ;;  %v1424_v30 = vld [vmem:[%s3491_s3 + $0x1f0] sm:$0xff]  ;;  %v1439_v9 = vld [vmem:[%s3491_s3 + $0xe8] sm:$0xff] }
 0x20b   :  { %979 = vmatpush.msrb.mxu1 %v1424_v30  ;;  %906 = vmatpush.msra.mxu3 %v1643_v7  ;;  %v1427_v7 = vld [vmem:[%s3491_s3 + $0x160] sm:$0xff]  ;;  %v1437_v28 = vld [vmem:[%s3491_s3 + $0x1d0] sm:$0xff]  ;;  %v1440_v30 = vld [vmem:[%s3491_s3 + $0x148] sm:$0xff] }
 0x20c   :  { %886 = vmatpush.msra.mxu2 %v1640_v6  ;;  %960 = vmatpush.msrb.mxu0 %v1425_v31  ;;  %v862_v6 = vsel %vm378_vm3, %v841_v39, %v1623_v53  ;;  %v1432_v53 = vld [vmem:[%s3491_s3 + $0x158] sm:$0xff]  ;;  %v1438_v39 = vld [vmem:[%s3491_s3 + $0x68] sm:$0xff] }
 0x20d   :  { %980 = vmatpush.msrb.mxu1 %v1426_v45  ;;  %907 = vmatpush.msra.mxu3 %v1599_v22  ;;  %v1430_v22 = vld [vmem:[%s3491_s3 + $0x78] sm:$0xff]  ;;  %v1441_v31 = vld [vmem:[%s3491_s3 + $0x1c8] sm:$0xff]  ;;  %v1442_v45 = vld [vmem:[%s3491_s3 + $0x60] sm:$0xff] }
 0x20e   :  { %887 = vmatpush.msra.mxu2 %v1595_v21  ;;  %961 = vmatpush.msrb.mxu0 %v1427_v7  ;;  %v1429_v21 = vld [vmem:[%s3489_s1] sm:$0xff] }
 0x20f   :  { %981 = vmatpush.msrb.mxu1 %v1428_v23  ;;  %908 = vmatpush.msra.mxu3 %v862_v6  ;;  %v1444_v6 = vld [vmem:[%s3491_s3 + $0x140] sm:$0xff]  ;;  %v1446_v23 = vld [vmem:[%s3491_s3 + $0x58] sm:$0xff] }
 0x210   :  { %888 = vmatpush.msra.mxu2 %v861_v46  ;;  %1367 = vmatmul.msk.f32.vlgmr.msra.gmra.mxu3 %vm387_vm9, %v1429_v21  ;;  %v1443_v46 = vld [vmem:[%s3491_s3 + $0xe0] sm:$0xff] }
 0x211   :  { %1365 = vmatmul.msk.f32.vlgmr.msra.gmra.mxu2 %vm387_vm9, %v1429_v21  ;;  %1018 = vmatpush.msrb.mxu3 %v1431_v52  ;;  %v1445_v7 = vld [vmem:[%s3491_s3 + $0x1c0] sm:$0xff]  ;;  %v1447_v21 = vld [vmem:[%s3491_s3 + $0xd8] sm:$0xff] }
 0x212   :  { %998 = vmatpush.msrb.mxu2 %v1430_v22  ;;  %962 = vmatpush.msrb.mxu0 %v1432_v53  ;;  %v1448_v22 = vld [vmem:[%s3491_s3 + $0x138] sm:$0xff]  ;;  %v1450_v53 = vld [vmem:[%s3491_s3 + $0x50] sm:$0xff] }
 0x213   :  { %982 = vmatpush.msrb.mxu1 %v1433_v19  ;;  %1019 = vmatpush.msrb.mxu3 %v1435_v37  ;;  %v1449_v52 = vld [vmem:[%s3491_s3 + $0x1b8] sm:$0xff]  ;;  %v1451_v19 = vld [vmem:[%s3491_s3 + $0xd0] sm:$0xff] }
 0x214   :  { %999 = vmatpush.msrb.mxu2 %v1434_v36  ;;  %963 = vmatpush.msrb.mxu0 %v1436_v17  ;;  %v1452_v36 = vld [vmem:[%s3491_s3 + $0x1b0] sm:$0xff]  ;;  %v1454_v17 = vld [vmem:[%s3491_s3 + $0x48] sm:$0xff] }
 0x215   :  { %983 = vmatpush.msrb.mxu1 %v1437_v28  ;;  %1020 = vmatpush.msrb.mxu3 %v1439_v9  ;;  %v1453_v37 = vld [vmem:[%s3491_s3 + $0x130] sm:$0xff]  ;;  %v1455_v28 = vld [vmem:[%s3491_s3 + $0xc8] sm:$0xff] }
 0x216   :  { %1000 = vmatpush.msrb.mxu2 %v1438_v39  ;;  %964 = vmatpush.msrb.mxu0 %v1440_v30  ;;  %v1456_v39 = vld [vmem:[%s3491_s3 + $0x128] sm:$0xff]  ;;  %v1458_v30 = vld [vmem:[%s3491_s3 + $0x40] sm:$0xff] }
 0x217   :  { %984 = vmatpush.msrb.mxu1 %v1441_v31  ;;  %1021 = vmatpush.msrb.mxu3 %v1443_v46  ;;  %v1457_v9 = vld [vmem:[%s3491_s3 + $0x1a8] sm:$0xff]  ;;  %v1459_v31 = vld [vmem:[%s3491_s3 + $0xc0] sm:$0xff] }
 0x218   :  { %1001 = vmatpush.msrb.mxu2 %v1442_v45  ;;  %965 = vmatpush.msrb.mxu0 %v1444_v6  ;;  %v1460_v45 = vld [vmem:[%s3491_s3 + $0x120] sm:$0xff]  ;;  %v1462_v6 = vld [vmem:[%s3491_s3 + $0x38] sm:$0xff] }
 0x219   :  { %985 = vmatpush.msrb.mxu1 %v1445_v7  ;;  %1022 = vmatpush.msrb.mxu3 %v1447_v21  ;;  %v1461_v46 = vld [vmem:[%s3491_s3 + $0x1a0] sm:$0xff]  ;;  %v1463_v7 = vld [vmem:[%s3491_s3 + $0xb8] sm:$0xff] }
 0x21a   :  { %1002 = vmatpush.msrb.mxu2 %v1446_v23  ;;  %966 = vmatpush.msrb.mxu0 %v1448_v22  ;;  %v1464_v23 = vld [vmem:[%s3491_s3 + $0x118] sm:$0xff]  ;;  %v1466_v22 = vld [vmem:[%s3491_s3 + $0x30] sm:$0xff] }
 0x21b   :  { %986 = vmatpush.msrb.mxu1 %v1449_v52  ;;  %1023 = vmatpush.msrb.mxu3 %v1451_v19  ;;  %v1465_v21 = vld [vmem:[%s3491_s3 + $0x198] sm:$0xff]  ;;  %v1467_v52 = vld [vmem:[%s3491_s3 + $0xb0] sm:$0xff] }
 0x21c   :  { %1003 = vmatpush.msrb.mxu2 %v1450_v53  ;;  %967 = vmatpush.msrb.mxu0 %v1453_v37  ;;  %v1468_v53 = vld [vmem:[%s3491_s3 + $0x190] sm:$0xff]  ;;  %v1471_v37 = vld [vmem:[%s3491_s3 + $0x28] sm:$0xff] }
 0x21d   :  { %987 = vmatpush.msrb.mxu1 %v1452_v36  ;;  %1024 = vmatpush.msrb.mxu3 %v1455_v28  ;;  %v1469_v19 = vld [vmem:[%s3491_s3 + $0x110] sm:$0xff]  ;;  %v1470_v36 = vld [vmem:[%s3491_s3 + $0xa8] sm:$0xff] }
 0x21e   :  { %1004 = vmatpush.msrb.mxu2 %v1454_v17  ;;  %968 = vmatpush.msrb.mxu0 %v1456_v39  ;;  %v1472_v17 = vld [vmem:[%s3491_s3 + $0x108] sm:$0xff]  ;;  %v1474_v39 = vld [vmem:[%s3491_s3 + $0x20] sm:$0xff] }
 0x21f   :  { %988 = vmatpush.msrb.mxu1 %v1457_v9  ;;  %1025 = vmatpush.msrb.mxu3 %v1459_v31  ;;  %v1473_v28 = vld [vmem:[%s3491_s3 + $0x188] sm:$0xff]  ;;  %v1475_v9 = vld [vmem:[%s3491_s3 + $0xa0] sm:$0xff] }
 0x220   :  { %1005 = vmatpush.msrb.mxu2 %v1458_v30  ;;  %969 = vmatpush.msrb.mxu0 %v1460_v45  ;;  %v1476_v30 = vld [vmem:[%s3491_s3 + $0x100] sm:$0xff]  ;;  %v1478_v45 = vld [vmem:[%s3491_s3 + $0x18] sm:$0xff] }
 0x221   :  { %989 = vmatpush.msrb.mxu1 %v1461_v46  ;;  %1026 = vmatpush.msrb.mxu3 %v1463_v7  ;;  %v1477_v31 = vld [vmem:[%s3491_s3 + $0x180] sm:$0xff]  ;;  %v1479_v46 = vld [vmem:[%s3491_s3 + $0x98] sm:$0xff] }
 0x222   :  { %1006 = vmatpush.msrb.mxu2 %v1462_v6  ;;  %970 = vmatpush.msrb.mxu0 %v1464_v23  ;;  %v1480_v6 = vld [vmem:[%s3491_s3 + $0x278] sm:$0xff]  ;;  %v1482_v23 = vld [vmem:[%s3491_s3 + $0x10] sm:$0xff] }
 0x223   :  { %990 = vmatpush.msrb.mxu1 %v1465_v21  ;;  %1027 = vmatpush.msrb.mxu3 %v1467_v52  ;;  %v1481_v7 = vld [vmem:[%s3491_s3 + $0x2f8] sm:$0xff]  ;;  %v1483_v21 = vld [vmem:[%s3491_s3 + $0x90] sm:$0xff]  ;;  %v1485_v52 = vld [vmem:[%s3491_s3 + $0x8] sm:$0xff] }
 0x224   :  { %1007 = vmatpush.msrb.mxu2 %v1466_v22  ;;  %971 = vmatpush.msrb.mxu0 %v1469_v19  ;;  %v1484_v22 = vld [vmem:[%s3491_s3 + $0x88] sm:$0xff]  ;;  %v1491_v19 = vld [vmem:[%s3491_s3 + $0x3f0] sm:$0xff] }
 0x225   :  { %991 = vmatpush.msrb.mxu1 %v1468_v53  ;;  %1028 = vmatpush.msrb.mxu3 %v1470_v36  ;;  %v1488_v53 = vld [vmem:[%s3491_s3 + $0x378] sm:$0xff]  ;;  %v3781_v36 = vld [vmem:[#allocation18_spill] sm:$0xff] }
 0x226   :  { %1008 = vmatpush.msrb.mxu2 %v1471_v37  ;;  %972 = vmatpush.msrb.mxu0 %v1472_v17  ;;  %v563_v37 = vpop.f32.mrf.mxu1 }
 0x227   :  { %992 = vmatpush.msrb.mxu1 %v1473_v28  ;;  %1029 = vmatpush.msrb.mxu3 %v1475_v9  ;;  %v3783_v9 = vld [vmem:[#allocation22_spill] sm:$0xff] }
 0x228   :  { %1009 = vmatpush.msrb.mxu2 %v1474_v39  ;;  %973 = vmatpush.msrb.mxu0 %v1476_v30  ;;  %v3782_v39 = vld [vmem:[#allocation21_spill] sm:$0xff] }
 0x229   :  { %993 = vmatpush.msrb.mxu1 %v1477_v31  ;;  %1030 = vmatpush.msrb.mxu3 %v1479_v46 }
 0x22a   :  { %1010 = vmatpush.msrb.mxu2 %v1478_v45  ;;  %1042 = vmatpush.msra.mxu0 %v1480_v6 }
 0x22b   :  { %1062 = vmatpush.msra.mxu1 %v1481_v7  ;;  %1031 = vmatpush.msrb.mxu3 %v1483_v21 }
 0x22c   :  { %1011 = vmatpush.msrb.mxu2 %v1482_v23  ;;  %1043 = vmatpush.msra.mxu0 %v1882_v29  ;;  %v1486_v29 = vld [vmem:[%s3491_s3] sm:$0xff] }
 0x22d   :  { %1063 = vmatpush.msra.mxu1 %v1887_v32  ;;  %1032 = vmatpush.msrb.mxu3 %v1484_v22  ;;  %v1487_v32 = vld [vmem:[%s3491_s3 + $0x80] sm:$0xff] }
 0x22e   :  { %1012 = vmatpush.msrb.mxu2 %v1485_v52  ;;  %1044 = vmatpush.msra.mxu0 %v1898_v35  ;;  %v1489_v35 = vld [vmem:[%s3491_s3 + $0x3f8] sm:$0xff]  ;;  %v652_v6 = vpop.f32.mrf.mxu1 }
 0x22f   :  { %1064 = vmatpush.msra.mxu1 %v1903_v38  ;;  %1033 = vmatpush.msrb.mxu3 %v1487_v32  ;;  %v1490_v38 = vld [vmem:[%s3491_s3 + $0x370] sm:$0xff] }
 0x230   :  { %1013 = vmatpush.msrb.mxu2 %v1486_v29  ;;  %1045 = vmatpush.msra.mxu0 %v1916_v41  ;;  %v1492_v41 = vld [vmem:[%s3491_s3 + $0x368] sm:$0xff] }
 0x231   :  { %1107 = vmatpush.msra.mxu3 %v1489_v35  ;;  %1065 = vmatpush.msra.mxu1 %v1921_v42  ;;  %v1493_v42 = vld [vmem:[%s3491_s3 + $0x3e8] sm:$0xff] }
 0x232   :  { %1087 = vmatpush.msra.mxu2 %v1488_v53  ;;  %1046 = vmatpush.msra.mxu0 %v1934_v47  ;;  %v1494_v47 = vld [vmem:[%s3491_s3 + $0x360] sm:$0xff] }
 0x233   :  { %1108 = vmatpush.msra.mxu3 %v1491_v19  ;;  %1066 = vmatpush.msra.mxu1 %v1939_v48  ;;  %v1495_v48 = vld [vmem:[%s3491_s3 + $0x3e0] sm:$0xff] }
 0x234   :  { %1088 = vmatpush.msra.mxu2 %v1490_v38  ;;  %1047 = vmatpush.msra.mxu0 %v1960_v51  ;;  %v1496_v51 = vld [vmem:[%s3491_s3 + $0x358] sm:$0xff] }
 0x235   :  { %1109 = vmatpush.msra.mxu3 %v1493_v42  ;;  %1067 = vmatpush.msra.mxu1 %v1965_v54  ;;  %v1497_v54 = vld [vmem:[%s3491_s3 + $0x3d8] sm:$0xff] }
 0x236   :  { %1089 = vmatpush.msra.mxu2 %v1492_v41  ;;  %1048 = vmatpush.msra.mxu0 %v1982_v57  ;;  %v3766_v57 = vld [vmem:[#allocation5_spill] sm:$0xff] }
 0x237   :  { %1110 = vmatpush.msra.mxu3 %v1495_v48  ;;  %1068 = vmatpush.msra.mxu1 %v1987_v58  ;;  %v3767_v58 = vld [vmem:[#allocation6_spill] sm:$0xff] }
 0x238   :  { %1090 = vmatpush.msra.mxu2 %v1494_v47  ;;  %1049 = vmatpush.msra.mxu0 %v2004_v61  ;;  %v3769_v61 = vld [vmem:[#allocation16_spill] sm:$0xff] }
 0x239   :  { %1111 = vmatpush.msra.mxu3 %v1497_v54  ;;  %1069 = vmatpush.msra.mxu1 %v2011_v62  ;;  %v3770_v62 = vld [vmem:[#allocation7_spill] sm:$0xff] }
 0x23a   :  { %1091 = vmatpush.msra.mxu2 %v1496_v51  ;;  %1050 = vmatpush.msra.mxu0 %v2028_v3  ;;  %v3773_v3 = vld [vmem:[#allocation20_spill] sm:$0xff] }
 0x23b   :  { %1112 = vmatpush.msra.mxu3 %v1946_v49  ;;  %1070 = vmatpush.msra.mxu1 %v2033_v4  ;;  %v3764_v49 = vld [vmem:[#allocation11_spill] sm:$0xff]  ;;  %v3774_v4 = vld [vmem:[#allocation9_spill] sm:$0xff] }
 0x23c   :  { %1092 = vmatpush.msra.mxu2 %v1951_v50  ;;  %1051 = vmatpush.msra.mxu0 %v2056_v0  ;;  %v3765_v50 = vld [vmem:[#allocation12_spill] sm:$0xff] }
 0x23d   :  { %1113 = vmatpush.msra.mxu3 %v1977_v56  ;;  %1071 = vmatpush.msra.mxu1 %v2061_v1  ;;  %v523_v56 = vpop.f32.mrf.mxu3  ;;  %v3777_v0 = vld [vmem:[#allocation24_spill] sm:$0xff]  ;;  %v543_v1 = vpop.f32.mrf.mxu0 }
 0x23e   :  { %1093 = vmatpush.msra.mxu2 %v1970_v55  ;;  %1052 = vmatpush.msra.mxu0 %v2080_v11  ;;  %v503_v55 = vpop.f32.mrf.mxu2  ;;  %v3778_v11 = vld [vmem:[#allocation13_spill] sm:$0xff] }
 0x23f   :  { %1114 = vmatpush.msra.mxu3 %v1999_v60  ;;  %1072 = vmatpush.msra.mxu1 %v2085_v12  ;;  %v3768_v60 = vld [vmem:[#allocation15_spill] sm:$0xff]  ;;  %v3779_v12 = vld [vmem:[#allocation14_spill] sm:$0xff] }
 0x240   :  { %1094 = vmatpush.msra.mxu2 %v1994_v59  ;;  %1053 = vmatpush.msra.mxu0 %v2102_v15  ;;  %v524_v59 = vadd.f32 %v523_v56, %v503_v55 }
 0x241   :  { %1115 = vmatpush.msra.mxu3 %v2021_v2  ;;  %1073 = vmatpush.msra.mxu1 %v2107_v16  ;;  %v3772_v2 = vld [vmem:[#allocation19_spill] sm:$0xff]  ;;  %v3780_v16 = vld [vmem:[#allocation17_spill] sm:$0xff]  ;;  %v742_v53 = vpop.f32.mrf.mxu1 }
 0x242   :  { %1095 = vmatpush.msra.mxu2 %v2016_v63  ;;  %1054 = vmatpush.msra.mxu0 %v3764_v49  ;;  %v3771_v63 = vld [vmem:[#allocation8_spill] sm:$0xff]  ;;  %v544_v15 = vadd.f32 %v543_v1, %v524_v59 }
 0x243   :  { %1116 = vmatpush.msra.mxu3 %v2045_v8  ;;  %1074 = vmatpush.msra.mxu1 %v3765_v50  ;;  %v3776_v8 = vld [vmem:[#allocation23_spill] sm:$0xff] }
 0x244   :  { %1096 = vmatpush.msra.mxu2 %v2040_v5  ;;  %1055 = vmatpush.msra.mxu0 %v3768_v60  ;;  %v3775_v5 = vld [vmem:[#allocation10_spill] sm:$0xff]  ;;  %v564_v30 = vadd.f32 %v563_v37, %v544_v15  ;;  %v3787_v37 = vld [vmem:[#allocation28_spill] sm:$0xff] }
 0x245   :  { %1117 = vmatpush.msra.mxu3 %v3767_v58  ;;  %1075 = vmatpush.msra.mxu1 %v3769_v61  ;;  %v607_v28 = vpop.f32.mrf.mxu3  ;;  %v632_v46 = vpop.f32.mrf.mxu0 }
 0x246   :  { %1097 = vmatpush.msra.mxu2 %v3766_v57  ;;  %1056 = vmatpush.msra.mxu0 %v3772_v2  ;;  %v587_v17 = vpop.f32.mrf.mxu2  ;;  %v653_v7 = vadd.f32 %v652_v6, %v632_v46  ;;  %v3798_v46 = vld [vmem:[#allocation39_spill] sm:$0xff]  ;;  %v3799_v6 = vld [vmem:[#allocation40_spill] sm:$0xff] }
 0x247   :  { %1118 = vmatpush.msra.mxu3 %v3771_v63  ;;  %1076 = vmatpush.msra.mxu1 %v3773_v3  ;;  %v608_v31 = vadd.f32 %v607_v28, %v587_v17  ;;  %v3791_v17 = vld [vmem:[#allocation32_spill] sm:$0xff]  ;;  %v3792_v28 = vld [vmem:[#allocation33_spill] sm:$0xff] }
 0x248   :  { %1098 = vmatpush.msra.mxu2 %v3770_v62  ;;  %1057 = vmatpush.msra.mxu0 %v3776_v8 }
 0x249   :  { %1119 = vmatpush.msra.mxu3 %v3775_v5  ;;  %1077 = vmatpush.msra.mxu1 %v3777_v0  ;;  %v610_v45 = vadd.f32 %v608_v31, %v564_v30  ;;  %v3795_v30 = vld [vmem:[#allocation36_spill] sm:$0xff]  ;;  %v3796_v31 = vld [vmem:[#allocation37_spill] sm:$0xff] }
 0x24a   :  { %1099 = vmatpush.msra.mxu2 %v3774_v4 }
 0x24b   :  { %1120 = vmatpush.msra.mxu3 %v3779_v12  ;;  %v655_v22 = vadd.f32 %v653_v7, %v610_v45  ;;  %v3797_v45 = vld [vmem:[#allocation38_spill] sm:$0xff]  ;;  %v3800_v7 = vld [vmem:[#allocation41_spill] sm:$0xff] }
 0x24c   :  { %1100 = vmatpush.msra.mxu2 %v3778_v11 }
 0x24d   :  { %1121 = vmatpush.msra.mxu3 %v3781_v36  ;;  %v722_v32 = vpop.f32.mrf.mxu0 }
 0x24e   :  { %1101 = vmatpush.msra.mxu2 %v3780_v16  ;;  %v677_v23 = vpop.f32.mrf.mxu2  ;;  %v697_v21 = vpop.f32.mrf.mxu3  ;;  %v743_v35 = vadd.f32 %v742_v53, %v722_v32  ;;  %v3806_v32 = vld [vmem:[#allocation47_spill] sm:$0xff]  ;;  %v3807_v53 = vld [vmem:[#allocation48_spill] sm:$0xff] }
 0x24f   :  { %1122 = vmatpush.msra.mxu3 %v3783_v9  ;;  %v698_v52 = vadd.f32 %v697_v21, %v677_v23  ;;  %v3794_v9 = vld [vmem:[#allocation35_spill] sm:$0xff]  ;;  %v3801_v23 = vld [vmem:[#allocation42_spill] sm:$0xff] }
 0x250   :  { %1102 = vmatpush.msra.mxu2 %v3782_v39  ;;  %v3793_v39 = vld [vmem:[#allocation34_spill] sm:$0xff]  ;;  %v3802_v21 = vld [vmem:[#allocation43_spill] sm:$0xff] }
 0x251   :  { %v700_v29 = vadd.f32 %v698_v52, %v655_v22  ;;  %v3803_v22 = vld [vmem:[#allocation44_spill] sm:$0xff]  ;;  %v3804_v52 = vld [vmem:[#allocation45_spill] sm:$0xff] }
 0x253   :  { %v745_v41 = vadd.f32 %v743_v35, %v700_v29  ;;  %v3805_v29 = vld [vmem:[#allocation46_spill] sm:$0xff]  ;;  %v3808_v35 = vld [vmem:[#allocation49_spill] sm:$0xff] }
 0x28b   :  { %v787_v19 = vpop.f32.mrf.mxu3 }
 0x28c   :  { %v767_v38 = vpop.f32.mrf.mxu2 }
 0x28d   :  { %v788_v42 = vadd.f32 %v787_v19, %v767_v38  ;;  %v3809_v38 = vld [vmem:[#allocation50_spill] sm:$0xff]  ;;  %v3810_v19 = vld [vmem:[#allocation51_spill] sm:$0xff] }
 0x28f   :  { %v3314_v47 = vadd.f32 %v788_v42, %v745_v41  ;;  %v3811_v41 = vld [vmem:[#allocation52_spill] sm:$0xff]  ;;  %v3812_v42 = vld [vmem:[#allocation53_spill] sm:$0xff] }
 0x293   :  { %v910_v51 = vpop.f32.mrf.mxu3 }
 0x294   :  { %v890_v48 = vpop.f32.mrf.mxu2  ;;  %917 = vrot.lane.b32.xlu2 %v910_v51, %s1529_s27 }
 0x295   :  { %935 = vrot.lane.b32.xlu0 %v890_v48, %s1530_s28  ;;  %915 = vrot.lane.b32.xlu1 %v890_v48, %s1529_s27 }
 0x29c   :  { %928 = vrot.lane.b32.xlu2 %v910_v51, %s1528_s26 }
 0x29d   :  { %926 = vrot.lane.b32.xlu1 %v890_v48, %s1528_s26 }
 0x2a5   :  { %937 = vrot.lane.b32.xlu1 %v910_v51, %s1530_s28 }
 0x2ee   :  { %v918_v49 = vpop.permute.xlu2 %917 }
 0x2f6   :  { %v929_v55 = vpop.permute.xlu2 %928 }
 0x307   :  { %v916_v54 = vpop.permute.xlu1 %915  ;;  %v936_v58 = vpop.permute.xlu0 %935 }
 0x308   :  { %v919_v56 = vsel %vm287_vm7, %v916_v54, %v918_v49  ;;  %v923_v57 = vsel %vm287_vm7, %v918_v49, %v916_v54  ;;  %v3815_v54 = vld [vmem:[#allocation56_spill] sm:$0xff]  ;;  %v3816_v49 = vld [vmem:[#allocation57_spill] sm:$0xff] }
 0x309   :  { %v924_v2 = vmax.f32 %v890_v48, %v919_v56  ;;  %v925_v3 = vmax.f32 %v910_v51, %v923_v57  ;;  %v3813_v48 = vld [vmem:[#allocation54_spill] sm:$0xff]  ;;  %v3814_v51 = vld [vmem:[#allocation55_spill] sm:$0xff]  ;;  %v3819_v56 = vld [vmem:[#allocation60_spill] sm:$0xff] }
 0x30a   :  { %v3820_v57 = vld [vmem:[#allocation61_spill] sm:$0xff] }
 0x30f   :  { %v927_v50 = vpop.permute.xlu1 %926 }
 0x310   :  { %v930_v60 = vsel %vm306_vm1, %v927_v50, %v929_v55  ;;  %v934_v61 = vsel %vm306_vm1, %v929_v55, %v927_v50  ;;  %v3817_v50 = vld [vmem:[#allocation58_spill] sm:$0xff]  ;;  %v3818_v55 = vld [vmem:[#allocation59_spill] sm:$0xff] }
 0x317   :  { %v938_v59 = vpop.permute.xlu1 %937 }
 0x318   :  { %v939_v62 = vsel %vm315_vm8, %v936_v58, %v938_v59  ;;  %v943_v63 = vsel %vm315_vm8, %v938_v59, %v936_v58  ;;  %v3821_v58 = vld [vmem:[#allocation62_spill] sm:$0xff]  ;;  %v3822_v59 = vld [vmem:[#allocation63_spill] sm:$0xff] }
 0x319   :  { %v944_v4 = vmax.f32 %v930_v60, %v939_v62  ;;  %v945_v5 = vmax.f32 %v934_v61, %v943_v63  ;;  %v3823_v60 = vld [vmem:[#allocation64_spill] sm:$0xff]  ;;  %v3824_v61 = vld [vmem:[#allocation65_spill] sm:$0xff]  ;;  %v3825_v62 = vld [vmem:[#allocation66_spill] sm:$0xff] }
 0x31a   :  { %v3826_v63 = vld [vmem:[#allocation67_spill] sm:$0xff] }
 0x31b   :  { %v946_v8 = vmax.f32 %v924_v2, %v944_v4  ;;  %v947_v0 = vmax.f32 %v925_v3, %v945_v5  ;;  %v3827_v2 = vld [vmem:[#allocation68_spill] sm:$0xff]  ;;  %v3828_v3 = vld [vmem:[#allocation69_spill] sm:$0xff]  ;;  %v3829_v4 = vld [vmem:[#allocation70_spill] sm:$0xff] }
 0x31c   :  { %v3830_v5 = vld [vmem:[#allocation71_spill] sm:$0xff] }
 0x31d   :  { %v948_v1 = vadd.f32 %v946_v8, %v2217_v20  ;;  %v949_v11 = vadd.f32 %v947_v0, %v2217_v20  ;;  %v3784_v20 = vld [vmem:[#allocation25_spill] sm:$0xff]  ;;  %v3831_v8 = vld [vmem:[#allocation72_spill] sm:$0xff] }
 0x31e   :  { %v3832_v0 = vld [vmem:[#allocation73_spill] sm:$0xff] }
 0x31f   :  { %v3330_v12 = vmax.f32 %v948_v1, 0.0  ;;  %v3332_v15 = vmax.f32 %v949_v11, 0.0  ;;  %v3833_v1 = vld [vmem:[#allocation74_spill] sm:$0xff]  ;;  %v3834_v11 = vld [vmem:[#allocation75_spill] sm:$0xff] }
 0x321   :  { %1014 = vmatmul.f32.vlgmr.msrb.gmra.mxu2 %v3330_v12  ;;  %1034 = vmatmul.f32.vlgmr.msrb.gmra.mxu3 %v3332_v15  ;;  %v954_v16 = vrot.slane %v3330_v12, 1  ;;  %v955_v36 = vrot.slane %v3332_v15, 1 }
 0x322   :  { %1177 = vmatpush.msrb.mxu2 %v2228_v18  ;;  %1197 = vmatpush.msrb.mxu3 %v2233_v43  ;;  %v3785_v18 = vld [vmem:[#allocation26_spill] sm:$0xff]  ;;  %v3786_v43 = vld [vmem:[#allocation27_spill] sm:$0xff] }
 0x323   :  { %974 = vmatmul.f32.vlgmr.msrb.gmra.mxu0 %v954_v16  ;;  %994 = vmatmul.f32.vlgmr.msrb.gmra.mxu1 %v955_v36  ;;  %v1173_v16 = vrot.slane %v3330_v12, 5  ;;  %v1174_v36 = vrot.slane %v3332_v15, 5 }
 0x324   :  { %1132 = vmatpush.msrb.mxu0 %v2242_v10  ;;  %1152 = vmatpush.msrb.mxu1 %v2247_v13  ;;  %v1083_v10 = vrot.slane %v3330_v12, 3  ;;  %v1084_v13 = vrot.slane %v3332_v15, 3 }
 0x325   :  { %1178 = vmatpush.msrb.mxu2 %v2254_v14  ;;  %1198 = vmatpush.msrb.mxu3 %v2259_v24  ;;  %v3788_v14 = vld [vmem:[#allocation29_spill] sm:$0xff]  ;;  %v3789_v24 = vld [vmem:[#allocation30_spill] sm:$0xff] }
 0x326   :  { %1133 = vmatpush.msrb.mxu0 %v2264_v25  ;;  %1153 = vmatpush.msrb.mxu1 %v2269_v26  ;;  %v3790_v25 = vld [vmem:[#allocation31_spill] sm:$0xff]  ;;  %v1038_v26 = vrot.slane %v3330_v12, 2 }
 0x327   :  { %1179 = vmatpush.msrb.mxu2 %v2276_v27  ;;  %1199 = vmatpush.msrb.mxu3 %v3784_v20  ;;  %v1039_v27 = vrot.slane %v3332_v15, 2  ;;  %v3835_v20 = vld [vmem:[#allocation76_spill] sm:$0xff] }
 0x328   :  { %1134 = vmatpush.msrb.mxu0 %v3785_v18  ;;  %1154 = vmatpush.msrb.mxu1 %v3786_v43  ;;  %v3836_v18 = vld [vmem:[#allocation77_spill] sm:$0xff]  ;;  %v3837_v43 = vld [vmem:[#allocation78_spill] sm:$0xff] }
 0x329   :  { %1180 = vmatpush.msrb.mxu2 %v3787_v37  ;;  %1200 = vmatpush.msrb.mxu3 %v3788_v14  ;;  %v1129_v37 = vrot.slane %v3332_v15, 4  ;;  %v3839_v14 = vld [vmem:[#allocation80_spill] sm:$0xff] }
 0x32a   :  { %1103 = vmatmul.f32.vlgmr.msra.gmra.mxu2 %v1083_v10  ;;  %1123 = vmatmul.f32.vlgmr.msra.gmra.mxu3 %v1084_v13  ;;  %v3838_v10 = vld [vmem:[#allocation79_spill] sm:$0xff]  ;;  %v1128_v13 = vrot.slane %v3330_v12, 4 }
 0x32b   :  { %1135 = vmatpush.msrb.mxu0 %v3789_v24  ;;  %1155 = vmatpush.msrb.mxu1 %v3790_v25  ;;  %v3840_v24 = vld [vmem:[#allocation81_spill] sm:$0xff]  ;;  %v3841_v25 = vld [vmem:[#allocation82_spill] sm:$0xff] }
 0x32c   :  { %1181 = vmatpush.msrb.mxu2 %v3791_v17  ;;  %1201 = vmatpush.msrb.mxu3 %v3792_v28  ;;  %v3844_v17 = vld [vmem:[#allocation85_spill] sm:$0xff]  ;;  %v3845_v28 = vld [vmem:[#allocation86_spill] sm:$0xff] }
 0x32d   :  { %1058 = vmatmul.f32.vlgmr.msra.gmra.mxu0 %v1038_v26  ;;  %1078 = vmatmul.f32.vlgmr.msra.gmra.mxu1 %v1039_v27  ;;  %v3842_v26 = vld [vmem:[#allocation83_spill] sm:$0xff]  ;;  %v3843_v27 = vld [vmem:[#allocation84_spill] sm:$0xff] }
 0x32e   :  { %1136 = vmatpush.msrb.mxu0 %v3793_v39  ;;  %1156 = vmatpush.msrb.mxu1 %v3794_v9  ;;  %v3846_v39 = vld [vmem:[#allocation87_spill] sm:$0xff]  ;;  %v3847_v9 = vld [vmem:[#allocation88_spill] sm:$0xff] }
 0x32f   :  { %1182 = vmatpush.msrb.mxu2 %v3795_v30  ;;  %1202 = vmatpush.msrb.mxu3 %v3796_v31  ;;  %v3848_v30 = vld [vmem:[#allocation89_spill] sm:$0xff]  ;;  %v3849_v31 = vld [vmem:[#allocation90_spill] sm:$0xff] }
 0x330   :  { %1137 = vmatpush.msrb.mxu0 %v3797_v45  ;;  %1157 = vmatpush.msrb.mxu1 %v3798_v46  ;;  %v3850_v45 = vld [vmem:[#allocation91_spill] sm:$0xff]  ;;  %v3851_v46 = vld [vmem:[#allocation92_spill] sm:$0xff] }
 0x331   :  { %1183 = vmatpush.msrb.mxu2 %v3799_v6  ;;  %1203 = vmatpush.msrb.mxu3 %v3800_v7  ;;  %v3852_v6 = vld [vmem:[#allocation93_spill] sm:$0xff]  ;;  %v3853_v7 = vld [vmem:[#allocation94_spill] sm:$0xff] }
 0x332   :  { %1138 = vmatpush.msrb.mxu0 %v3801_v23  ;;  %1158 = vmatpush.msrb.mxu1 %v3802_v21  ;;  %v3854_v23 = vld [vmem:[#allocation95_spill] sm:$0xff]  ;;  %v3855_v21 = vld [vmem:[#allocation96_spill] sm:$0xff] }
 0x333   :  { %1184 = vmatpush.msrb.mxu2 %v3803_v22  ;;  %1204 = vmatpush.msrb.mxu3 %v3804_v52  ;;  %v3856_v22 = vld [vmem:[#allocation97_spill] sm:$0xff]  ;;  %v3857_v52 = vld [vmem:[#allocation98_spill] sm:$0xff] }
 0x334   :  { %1139 = vmatpush.msrb.mxu0 %v3805_v29  ;;  %1159 = vmatpush.msrb.mxu1 %v3806_v32  ;;  %v3858_v29 = vld [vmem:[#allocation99_spill] sm:$0xff]  ;;  %v3859_v32 = vld [vmem:[#allocation100_spill] sm:$0xff] }
 0x335   :  { %1185 = vmatpush.msrb.mxu2 %v3807_v53  ;;  %1205 = vmatpush.msrb.mxu3 %v3808_v35  ;;  %v3860_v53 = vld [vmem:[#allocation101_spill] sm:$0xff]  ;;  %v3861_v35 = vld [vmem:[#allocation102_spill] sm:$0xff] }
 0x336   :  { %1140 = vmatpush.msrb.mxu0 %v3809_v38  ;;  %1160 = vmatpush.msrb.mxu1 %v3810_v19  ;;  %v3862_v38 = vld [vmem:[#allocation103_spill] sm:$0xff]  ;;  %v3863_v19 = vld [vmem:[#allocation104_spill] sm:$0xff] }
 0x337   :  { %1186 = vmatpush.msrb.mxu2 %v3811_v41  ;;  %1206 = vmatpush.msrb.mxu3 %v3812_v42  ;;  %v3864_v41 = vld [vmem:[#allocation105_spill] sm:$0xff]  ;;  %v3865_v42 = vld [vmem:[#allocation106_spill] sm:$0xff] }
 0x338   :  { %1141 = vmatpush.msrb.mxu0 %v3813_v48  ;;  %1161 = vmatpush.msrb.mxu1 %v3814_v51  ;;  %v3866_v48 = vld [vmem:[#allocation107_spill] sm:$0xff]  ;;  %v3867_v51 = vld [vmem:[#allocation108_spill] sm:$0xff] }
 0x339   :  { %1187 = vmatpush.msrb.mxu2 %v3815_v54  ;;  %1207 = vmatpush.msrb.mxu3 %v3816_v49  ;;  %v3868_v54 = vld [vmem:[#allocation109_spill] sm:$0xff]  ;;  %v3869_v49 = vld [vmem:[#allocation110_spill] sm:$0xff] }
 0x33a   :  { %1142 = vmatpush.msrb.mxu0 %v3817_v50  ;;  %1162 = vmatpush.msrb.mxu1 %v3818_v55  ;;  %v3870_v50 = vld [vmem:[#allocation111_spill] sm:$0xff]  ;;  %v3871_v55 = vld [vmem:[#allocation112_spill] sm:$0xff] }
 0x33b   :  { %1188 = vmatpush.msrb.mxu2 %v3819_v56  ;;  %1208 = vmatpush.msrb.mxu3 %v3820_v57  ;;  %v3872_v56 = vld [vmem:[#allocation113_spill] sm:$0xff]  ;;  %v3873_v57 = vld [vmem:[#allocation114_spill] sm:$0xff] }
 0x33c   :  { %1143 = vmatpush.msrb.mxu0 %v3821_v58  ;;  %1163 = vmatpush.msrb.mxu1 %v3822_v59  ;;  %v3874_v58 = vld [vmem:[#allocation115_spill] sm:$0xff]  ;;  %v3875_v59 = vld [vmem:[#allocation116_spill] sm:$0xff] }
 0x33d   :  { %1189 = vmatpush.msrb.mxu2 %v3823_v60  ;;  %1209 = vmatpush.msrb.mxu3 %v3824_v61  ;;  %v3876_v60 = vld [vmem:[#allocation117_spill] sm:$0xff]  ;;  %v3877_v61 = vld [vmem:[#allocation118_spill] sm:$0xff] }
 0x33e   :  { %1144 = vmatpush.msrb.mxu0 %v3825_v62  ;;  %1164 = vmatpush.msrb.mxu1 %v3826_v63  ;;  %v3878_v62 = vld [vmem:[#allocation119_spill] sm:$0xff]  ;;  %v3879_v63 = vld [vmem:[#allocation120_spill] sm:$0xff] }
 0x33f   :  { %1190 = vmatpush.msrb.mxu2 %v3827_v2  ;;  %1210 = vmatpush.msrb.mxu3 %v3828_v3  ;;  %v3880_v2 = vld [vmem:[#allocation121_spill] sm:$0xff]  ;;  %v3881_v3 = vld [vmem:[#allocation122_spill] sm:$0xff] }
 0x340   :  { %1145 = vmatpush.msrb.mxu0 %v3829_v4  ;;  %1165 = vmatpush.msrb.mxu1 %v3830_v5  ;;  %v3882_v4 = vld [vmem:[#allocation123_spill] sm:$0xff]  ;;  %v3883_v5 = vld [vmem:[#allocation124_spill] sm:$0xff] }
 0x341   :  { %1191 = vmatpush.msrb.mxu2 %v3831_v8  ;;  %1211 = vmatpush.msrb.mxu3 %v3832_v0  ;;  %v3884_v8 = vld [vmem:[#allocation125_spill] sm:$0xff]  ;;  %v3885_v0 = vld [vmem:[#allocation126_spill] sm:$0xff] }
 0x342   :  { %1146 = vmatpush.msrb.mxu0 %v3833_v1  ;;  %1166 = vmatpush.msrb.mxu1 %v3834_v11  ;;  %v3886_v1 = vld [vmem:[#allocation127_spill] sm:$0xff]  ;;  %v3887_v11 = vld [vmem:[#allocation128_spill] sm:$0xff] }
 0x343   :  { %1192 = vmatpush.msrb.mxu2 %v3835_v20  ;;  %1212 = vmatpush.msrb.mxu3 %v3836_v18  ;;  %v3890_v20 = vld [vmem:[#allocation131_spill] sm:$0xff]  ;;  %v3891_v18 = vld [vmem:[#allocation132_spill] sm:$0xff] }
 0x344   :  { %1193 = vmatmul.f32.vlgmr.msrb.gmra.mxu2 %v1173_v16  ;;  %1213 = vmatmul.f32.vlgmr.msrb.gmra.mxu3 %v1174_v36  ;;  %v3888_v16 = vld [vmem:[#allocation129_spill] sm:$0xff]  ;;  %v3889_v36 = vld [vmem:[#allocation130_spill] sm:$0xff] }
 0x345   :  { %1267 = vmatpush.msra.mxu2 %v3837_v43  ;;  %1287 = vmatpush.msra.mxu3 %v3838_v10  ;;  %v3892_v43 = vld [vmem:[#allocation133_spill] sm:$0xff]  ;;  %v3893_v10 = vld [vmem:[#allocation134_spill] sm:$0xff] }
 0x346   :  { %1147 = vmatpush.msrb.mxu0 %v3839_v14  ;;  %1167 = vmatpush.msrb.mxu1 %v3840_v24  ;;  %v3896_v14 = vld [vmem:[#allocation137_spill] sm:$0xff]  ;;  %v3897_v24 = vld [vmem:[#allocation138_spill] sm:$0xff] }
 0x347   :  { %1148 = vmatmul.f32.vlgmr.msrb.gmra.mxu0 %v1128_v13  ;;  %1168 = vmatmul.f32.vlgmr.msrb.gmra.mxu1 %v1129_v37  ;;  %v3894_v13 = vld [vmem:[#allocation135_spill] sm:$0xff]  ;;  %v3895_v37 = vld [vmem:[#allocation136_spill] sm:$0xff] }
 0x348   :  { %1222 = vmatpush.msra.mxu0 %v3841_v25  ;;  %1242 = vmatpush.msra.mxu1 %v3842_v26  ;;  %v3898_v25 = vld [vmem:[#allocation139_spill] sm:$0xff]  ;;  %v1263_v26 = vrot.slane %v3330_v12, 7 }
 0x349   :  { %1268 = vmatpush.msra.mxu2 %v3843_v27  ;;  %1288 = vmatpush.msra.mxu3 %v3844_v17  ;;  %v1264_v27 = vrot.slane %v3332_v15, 7  ;;  %v1218_v17 = vrot.slane %v3330_v12, 6 }
 0x34a   :  { %1223 = vmatpush.msra.mxu0 %v3845_v28  ;;  %1243 = vmatpush.msra.mxu1 %v3846_v39  ;;  %v1219_v28 = vrot.slane %v3332_v15, 6  ;;  %v812_v39 = vpop.f32.mrf.mxu0 }
 0x34b   :  { %1269 = vmatpush.msra.mxu2 %v3847_v9  ;;  %1289 = vmatpush.msra.mxu3 %v3848_v30  ;;  %v832_v9 = vpop.f32.mrf.mxu1 }
 0x34c   :  { %1224 = vmatpush.msra.mxu0 %v3849_v31  ;;  %1244 = vmatpush.msra.mxu1 %v3850_v45 }
 0x34d   :  { %1270 = vmatpush.msra.mxu2 %v3851_v46  ;;  %1290 = vmatpush.msra.mxu3 %v3852_v6 }
 0x34e   :  { %1225 = vmatpush.msra.mxu0 %v3853_v7  ;;  %1245 = vmatpush.msra.mxu1 %v3854_v23 }
 0x34f   :  { %1271 = vmatpush.msra.mxu2 %v3855_v21  ;;  %1291 = vmatpush.msra.mxu3 %v3856_v22 }
 0x350   :  { %1226 = vmatpush.msra.mxu0 %v3857_v52  ;;  %1246 = vmatpush.msra.mxu1 %v3858_v29 }
 0x351   :  { %1272 = vmatpush.msra.mxu2 %v3859_v32  ;;  %1292 = vmatpush.msra.mxu3 %v3860_v53 }
 0x352   :  { %1227 = vmatpush.msra.mxu0 %v3861_v35  ;;  %1247 = vmatpush.msra.mxu1 %v3862_v38 }
 0x353   :  { %1273 = vmatpush.msra.mxu2 %v3863_v19  ;;  %1293 = vmatpush.msra.mxu3 %v3864_v41 }
 0x354   :  { %1228 = vmatpush.msra.mxu0 %v3865_v42  ;;  %1248 = vmatpush.msra.mxu1 %v3866_v48 }
 0x355   :  { %1274 = vmatpush.msra.mxu2 %v3867_v51  ;;  %1294 = vmatpush.msra.mxu3 %v3868_v54 }
 0x356   :  { %1229 = vmatpush.msra.mxu0 %v3869_v49  ;;  %1249 = vmatpush.msra.mxu1 %v3870_v50 }
 0x357   :  { %1275 = vmatpush.msra.mxu2 %v3871_v55  ;;  %1295 = vmatpush.msra.mxu3 %v3872_v56  ;;  %v833_v56 = vadd.f32 %v832_v9, %v812_v39 }
 0x358   :  { %1230 = vmatpush.msra.mxu0 %v3873_v57  ;;  %1250 = vmatpush.msra.mxu1 %v3874_v58  ;;  %v1414_v58 = vld [vmem:[%s3492_s4] ss:$0 sm:$0xff]  ;;  %s1533_s4 = smov [#allocation2]  }
 0x359   :  { %1276 = vmatpush.msra.mxu2 %v3875_v59  ;;  %1296 = vmatpush.msra.mxu3 %v3876_v60  ;;  %v835_v59 = vadd.f32 %v833_v56, %v3314_v47  ;;  %s1349_s27 = sshll.u32 %s1533_s4, 4  ;;  %s1350_s27 = int_to_ptr.vmem [resolvable:$true] %s1349_s27 }
 0x35a   :  { %1231 = vmatpush.msra.mxu0 %v3877_v61  ;;  %1251 = vmatpush.msra.mxu1 %v3878_v62 }
 0x35b   :  { %1277 = vmatpush.msra.mxu2 %v3879_v63  ;;  %1297 = vmatpush.msra.mxu3 %v3880_v2 }
 0x35c   :  { %1232 = vmatpush.msra.mxu0 %v3881_v3  ;;  %1252 = vmatpush.msra.mxu1 %v3882_v4 }
 0x35d   :  { %1278 = vmatpush.msra.mxu2 %v3883_v5  ;;  %1298 = vmatpush.msra.mxu3 %v3884_v8 }
 0x35e   :  { %1233 = vmatpush.msra.mxu0 %v3885_v0  ;;  %1253 = vmatpush.msra.mxu1 %v3886_v1 }
 0x35f   :  { %1279 = vmatpush.msra.mxu2 %v3887_v11  ;;  %1299 = vmatpush.msra.mxu3 %v3888_v16 }
 0x360   :  { %1234 = vmatpush.msra.mxu0 %v3889_v36  ;;  %1254 = vmatpush.msra.mxu1 %v3890_v20 }
 0x361   :  { %1280 = vmatpush.msra.mxu2 %v3891_v18  ;;  %1300 = vmatpush.msra.mxu3 %v3892_v43 }
 0x362   :  { %1235 = vmatpush.msra.mxu0 %v3893_v10  ;;  %1255 = vmatpush.msra.mxu1 %v3894_v13 }
 0x363   :  { %1281 = vmatpush.msra.mxu2 %v3895_v37  ;;  %1301 = vmatpush.msra.mxu3 %v3896_v14 }
 0x364   :  { %1236 = vmatpush.msra.mxu0 %v3897_v24  ;;  %1256 = vmatpush.msra.mxu1 %v3898_v25 }
 0x365   :  { %1282 = vmatpush.msra.mxu2 %v2980_v34  ;;  %1302 = vmatpush.msra.mxu3 %v2985_v44 }
 0x366   :  { %1283 = vmatmul.f32.vlgmr.msra.gmra.mxu2 %v1263_v26  ;;  %1303 = vmatmul.f32.vlgmr.msra.gmra.mxu3 %v1264_v27 }
 0x367   :  { %1237 = vmatpush.msra.mxu0 %v2996_v40  ;;  %1257 = vmatpush.msra.mxu1 %v3001_v33 }
 0x368   :  { %1238 = vmatmul.f32.vlgmr.msra.gmra.mxu0 %v1218_v17  ;;  %1258 = vmatmul.f32.vlgmr.msra.gmra.mxu1 %v1219_v28 }
 0x3a0   :  { %v975_v30 = vpop.f32.mrf.mxu0  ;;  %v995_v31 = vpop.f32.mrf.mxu1 }
 0x3a1   :  { %v996_v23 = vadd.f32 %v995_v31, %v975_v30 }
 0x3a4   :  { %v1015_v45 = vpop.f32.mrf.mxu2  ;;  %v1035_v34 = vpop.f32.mrf.mxu3 }
 0x3a5   :  { %v1016_v12 = vadd.f32 %v1015_v45, %v996_v23 }
 0x3a7   :  { %v1036_v40 = vadd.f32 %v1035_v34, %v1016_v12 }
 0x3aa   :  { %v1059_v46 = vpop.f32.mrf.mxu0  ;;  %v1079_v44 = vpop.f32.mrf.mxu1 }
 0x3ab   :  { %v1080_v22 = vadd.f32 %v1079_v44, %v1059_v46 }
 0x3ad   :  { %v1104_v6 = vpop.f32.mrf.mxu2  ;;  %v1124_v7 = vpop.f32.mrf.mxu3  ;;  %v1082_v32 = vadd.f32 %v1080_v22, %v1036_v40 }
 0x3ae   :  { %v1125_v52 = vadd.f32 %v1124_v7, %v1104_v6 }
 0x3b0   :  { %v1127_v35 = vadd.f32 %v1125_v52, %v1082_v32 }
 0x3c4   :  { %v1149_v21 = vpop.f32.mrf.mxu0  ;;  %v1169_v15 = vpop.f32.mrf.mxu1 }
 0x3c5   :  { %v1170_v53 = vadd.f32 %v1169_v15, %v1149_v21 }
 0x3c7   :  { %v1194_v33 = vpop.f32.mrf.mxu2  ;;  %v1214_v29 = vpop.f32.mrf.mxu3  ;;  %v1172_v42 = vadd.f32 %v1170_v53, %v1127_v35 }
 0x3c8   :  { %v1215_v38 = vadd.f32 %v1214_v29, %v1194_v33 }
 0x3ca   :  { %v1217_v51 = vadd.f32 %v1215_v38, %v1172_v42 }
 0x3e5   :  { %v1239_v19 = vpop.f32.mrf.mxu0  ;;  %v1259_v41 = vpop.f32.mrf.mxu1 }
 0x3e6   :  { %v1260_v48 = vadd.f32 %v1259_v41, %v1239_v19 }
 0x3e8   :  { %v1262_v50 = vadd.f32 %v1260_v48, %v1217_v51 }
 0x3e9   :  { %v1284_v54 = vpop.f32.mrf.mxu2  ;;  %v1304_v49 = vpop.f32.mrf.mxu3 }
 0x3ea   :  { %v1305_v55 = vadd.f32 %v1304_v49, %v1284_v54 }
 0x3ec   :  { %v1307_v57 = vadd.f32 %v1305_v55, %v1262_v50 }
 0x3ee   :  { %v1309_v60 = vrot.slane %v1307_v57, 7 }
 0x3f0   :  { %v1312_v61 = vsel %vm1311_vm10, %v835_v59, %v1309_v60 }
 0x3f1   :  { %v1317_v62 = vadd.f32 %v1414_v58, %v1312_v61 }
 0x3f3   :  { %v1319_v63 = vsel %vm1318_vm11, %v1317_v62, -inf }
 0x3f4   :  { %1320 = vmax.xlane.f32.xlu2 %v1319_v63 }
 0x467   :  { %v1321_v2 = vpop.xlane.xlu2 %1320 }
 0x468   :  { %v1322_v3 = vsub.f32 %v1317_v62, %v1321_v2 }
 0x46a   :  { %v1323_v4 = vmul.f32 1.442695, %v1322_v3 }
 0x46c   :  { %1415 = vpow2.f32 %v1323_v4 }
 0x472   :  { %v1416_v5 = vpop.eup %1415 }
 0x473   :  { %v1325_v8 = vsel %vm1318_vm11, %v1416_v5, 0.0 }
 0x474   :  { %1326 = vadd.xlane.f32.xlu0 %v1325_v8 }
 0x4e7   :  { %v1327_v0 = vpop.xlane.xlu0 %1326 }
 0x4e8   :  { %1417 = vrcp.f32 %v1327_v0  ;;  %v1339_v16 = vand.u32 2147483648, %v1327_v0  ;;  %v1337_v20 = vand.u32 2147483647, %v1327_v0  ;;  %vm1333_vm13 = vweird.f32 %v1327_v0 }
 0x4ea   :  { %v1340_v43 = vor.u32 1.1754944e-38, %v1339_v16  ;;  %vm1338_vm15 = vcmp.eq.f32.partialorder %v1337_v20, 8.507059e+37 }
 0x4ee   :  { %v1418_v1 = vpop.eup %1417 }
 0x4ef   :  { %v1329_v11 = vmul.f32 %v1418_v1, %v1327_v0  ;;  %vm1334_vm12 = vweird.f32 %v1418_v1 }
 0x4f0   :  { %vm1335_vm14 = vmor %vm1333_vm13, %vm1334_vm12 }
 0x4f1   :  { %v1330_v47 = vsub.f32 1.0, %v1329_v11 }
 0x4f3   :  { %v1331_v36 = vmul.f32 %v1418_v1, %v1330_v47 }
 0x4f5   :  { %v1332_v18 = vadd.f32 %v1418_v1, %v1331_v36 }
 0x4f7   :  { %v1336_v10 = vsel %vm1335_vm14, %v1418_v1, %v1332_v18 }
 0x4f8   :  { %v1341_v13 = vsel %vm1338_vm15, %v1340_v43, %v1336_v10 }
 0x4f9   :  { %v1342_v37 = vmul.f32 %v1416_v5, %v1341_v13 }
 0x4fb   :  { %1343 = vst.msk [vmem:[#allocation2] sm:$0x3] %vm1318_vm11, %v1342_v37 }
 0x4fc   :  { %1354 = dma.vmem_to_hbm [thread:$0]  %s1350_s27, 32, %s1352_s29, [#allocation3]  }
 0x4fd   :  { %1522 = dma.done.wait [#allocation3], 32  }
 0x4fe   :  { %1523 = vsyncadd [#allocation3], 4294967264 }
 0x4ff   :  { %1359 = vsyncpa [#allocation3], 1 }

</bundles_post_ra>
